<compile_context>
chip_gen: v7x
topology: tpu7x:2x2x1
jax: 0.10.0
libtpu: 0.0.40
codegen_flags: <defaults>
</compile_context>

<pallas_src>
import math
import functools

import jax
import jax.numpy as jnp
from jax import lax
from jax.experimental import pallas as pl
from jax.experimental.pallas import tpu as pltpu

LN_EPS = 1e-5        # nn.LayerNorm default eps (LinearLayer, TrainablePositionalEncoding)
BERT_LN_EPS = 1e-12  # BertSelfOutput LayerNorm eps
NEG_INF = -1e10      # mask_logits constant
ATTN_NEG = -10000.0  # BertSelfAttention additive mask constant

VMEM_LIMIT = 48 * 1024 * 1024   # explicit scoped-VMEM cap (safe on v5e/v6e/v7x)


def _cparams(*sem):
    return pltpu.CompilerParams(dimension_semantics=tuple(sem),
                                vmem_limit_bytes=VMEM_LIMIT)


# --------------------------------------------------------------------------- Buffered(1) probe

_BUFFERED1 = None   # tri-state cache: None = unprobed, False = unsupported, else Buffered(1)


def _buffered_single():
    """Feature-detect pl.Buffered(1) for single-buffering grid-invariant operands."""
    global _BUFFERED1
    if _BUFFERED1 is None:
        try:
            def _probe_kernel(x_ref, o_ref):
                o_ref[...] = x_ref[...] + 1.0

            out = pl.pallas_call(
                _probe_kernel,
                out_shape=jax.ShapeDtypeStruct((16, 128), jnp.float32),
                grid=(2,),
                in_specs=[pl.BlockSpec((8, 128), lambda i: (0, 0),
                                       pipeline_mode=pl.Buffered(1))],
                out_specs=pl.BlockSpec((8, 128), lambda i: (i, 0)),
            )(jnp.zeros((8, 128), jnp.float32))
            jax.block_until_ready(out)
            _BUFFERED1 = pl.Buffered(1)
        except Exception:
            _BUFFERED1 = False
    return None if _BUFFERED1 is False else _BUFFERED1


def _bcast_spec(shape):
    """Spec for a grid-invariant operand (constant index map, single-buffered if possible)."""
    zero = (0,) * len(shape)
    pm = _buffered_single()
    if pm is not None:
        return pl.BlockSpec(shape, lambda i: zero, pipeline_mode=pm)
    return pl.BlockSpec(shape, lambda i: zero)


# --------------------------------------------------------------------------- in-kernel helpers

def _layer_norm(x, g, b, eps):
    mu = jnp.mean(x, axis=-1, keepdims=True)
    var = jnp.mean(jnp.square(x - mu), axis=-1, keepdims=True)
    return (x - mu) * lax.rsqrt(var + eps) * g + b


def _bert_attention(h, att_bias, wq, bq, wk, bk, wv, bv, wo, bo, lg, lb, n_heads):
    """BertSelfAttention + BertSelfOutput (dense + residual + LN).

    h: (L, D) f32; att_bias: (1, L) f32; wq/wk/wv/wo: (D, D) bf16; biases f32.
    Full-width bf16 projections on the MXU; heads split via static lane slices so the
    (H, L, L) score tensor is never materialized.
    """
    L, D = h.shape
    E = D // n_heads
    scale = 1.0 / math.sqrt(E)
    hb = h.astype(jnp.bfloat16)

    q = jnp.dot(hb, wq, preferred_element_type=jnp.float32) + bq          # (L, D)
    k = jnp.dot(hb, wk, preferred_element_type=jnp.float32) + bk          # (L, D)
    v = jnp.dot(hb, wv, preferred_element_type=jnp.float32) + bv          # (L, D)

    dn = (((1,), (1,)), ((), ()))                                         # contract last dims
    ctx_heads = []
    for hh in range(n_heads):                                             # static unroll
        lo = hh * E
        qh = q[:, lo:lo + E].astype(jnp.bfloat16)
        kh = k[:, lo:lo + E].astype(jnp.bfloat16)
        vh = v[:, lo:lo + E].astype(jnp.bfloat16)
        s = lax.dot_general(qh, kh, dn, preferred_element_type=jnp.float32)   # (L, L)
        s = s * scale + att_bias                                          # additive BERT mask
        s = s - jnp.max(s, axis=-1, keepdims=True)
        p = jnp.exp(s)
        p = p * pl.reciprocal(jnp.sum(p, axis=-1, keepdims=True), approx=True)
        ctx_heads.append(jnp.dot(p.astype(jnp.bfloat16), vh,
                                 preferred_element_type=jnp.float32))     # (L, E)

    ctx = jnp.concatenate(ctx_heads, axis=-1).astype(jnp.bfloat16)        # (L, D)
    out = jnp.dot(ctx, wo, preferred_element_type=jnp.float32) + bo       # (L, D)
    y = out + h                                                           # residual
    return _layer_norm(y, lg, lb, BERT_LN_EPS)


# --------------------------------------------------------------------------- fused encoder kernels

def _encode_ctx_kernel(x_ref, m_ref,
                       pg_ref, pb_ref, pw_ref, pbias_ref,
                       pe_ref, peg_ref, peb_ref,
                       wq_ref, bq_ref, wk_ref, bk_ref, wv_ref, bv_ref,
                       wo_ref, bo_ref, lg_ref, lb_ref,
                       o_ref, *, n_heads):
    # LinearLayer: LayerNorm -> Dropout(identity) -> Linear(bf16 MXU) -> ReLU
    h = _layer_norm(x_ref[0], pg_ref[...], pb_ref[...], LN_EPS)
    h = jnp.dot(h.astype(jnp.bfloat16), pw_ref[...],
                preferred_element_type=jnp.float32) + pbias_ref[...]
    h = jnp.maximum(h, 0.0)
    # TrainablePositionalEncoding: LayerNorm(h + pos_emb)
    h = _layer_norm(h + pe_ref[...], peg_ref[...], peb_ref[...], LN_EPS)
    att_bias = (1.0 - m_ref[0]) * ATTN_NEG                                # (1, L)
    o_ref[0] = _bert_attention(h, att_bias,
                               wq_ref[...], bq_ref[...], wk_ref[...], bk_ref[...],
                               wv_ref[...], bv_ref[...], wo_ref[...], bo_ref[...],
                               lg_ref[...], lb_ref[...], n_heads)


def _encode_joint_kernel(a_ref, b_ref, m_ref,
                         pe_ref, peg_ref, peb_ref,
                         wq_ref, bq_ref, wk_ref, bk_ref, wv_ref, bv_ref,
                         wo_ref, bo_ref, lg_ref, lb_ref,
                         o_ref, *, n_heads):
    h = a_ref[0] + b_ref[0]                                               # fuse_mode == 'add'
    h = _layer_norm(h + pe_ref[...], peg_ref[...], peb_ref[...], LN_EPS)
    att_bias = (1.0 - m_ref[0]) * ATTN_NEG
    o_ref[0] = _bert_attention(h, att_bias,
                               wq_ref[...], bq_ref[...], wk_ref[...], bk_ref[...],
                               wv_ref[...], bv_ref[...], wo_ref[...], bo_ref[...],
                               lg_ref[...], lb_ref[...], n_heads)


def _encode_query_kernel(x_ref, m_ref,
                         pg_ref, pb_ref, pw_ref, pbias_ref,
                         pe_ref, peg_ref, peb_ref,
                         wq_ref, bq_ref, wk_ref, bk_ref, wv_ref, bv_ref,
                         wo_ref, bo_ref, lg_ref, lb_ref,
                         modw_ref, modb_ref,
                         o_ref, *, n_heads):
    h = _layer_norm(x_ref[0], pg_ref[...], pb_ref[...], LN_EPS)
    h = jnp.dot(h.astype(jnp.bfloat16), pw_ref[...],
                preferred_element_type=jnp.float32) + pbias_ref[...]
    h = jnp.maximum(h, 0.0)
    h = _layer_norm(h + pe_ref[...], peg_ref[...], peb_ref[...], LN_EPS)
    mrow = m_ref[0]                                                       # (1, L)
    att_bias = (1.0 - mrow) * ATTN_NEG
    enc_q = _bert_attention(h, att_bias,
                            wq_ref[...], bq_ref[...], wk_ref[...], bk_ref[...],
                            wv_ref[...], bv_ref[...], wo_ref[...], bo_ref[...],
                            lg_ref[...], lb_ref[...], n_heads)            # (Lq, D) f32
    # get_modularized_queries, reoriented to (3, L): lane-dense mask/softmax over L.
    s3 = lax.dot_general(modw_ref[...], enc_q, (((1,), (1,)), ((), ())),
                         preferred_element_type=jnp.float32) + modb_ref[...]   # (3, L)
    s3 = jnp.where(mrow != 0.0, s3, NEG_INF)
    s3 = s3 - jnp.max(s3, axis=-1, keepdims=True)
    p3 = jnp.exp(s3)
    p3 = p3 * pl.reciprocal(jnp.sum(p3, axis=-1, keepdims=True), approx=True)
    o_ref[0] = jnp.dot(p3, enc_q, preferred_element_type=jnp.float32)     # (3, D)


# --------------------------------------------------------------------------- prediction kernels

def _scores_kernel(qv_ref, qs_ref, cv_ref, cs_ref, mv_ref, ms_ref, o_ref):
    """get_video_level_scores (video & sub fused, 0.5*(v+s)); one context per grid step."""
    n = pl.program_id(0)

    @pl.when(n == 0)
    def _():
        o_ref[...] = jnp.zeros(o_ref.shape, o_ref.dtype)

    def l2norm(a):  # F.normalize(dim=-1): x / max(||x||, 1e-12)
        return a * lax.rsqrt(jnp.maximum(jnp.sum(a * a, axis=-1, keepdims=True), 1e-24))

    qv = l2norm(qv_ref[...])                                              # (M, D)
    qs = l2norm(qs_ref[...])
    cv = l2norm(cv_ref[0])                                                # (L, D)
    cs = l2norm(cs_ref[0])
    dn = (((1,), (1,)), ((), ()))
    sv = lax.dot_general(qv, cv, dn, preferred_element_type=jnp.float32)  # (M, L)  f32 cosine
    ss = lax.dot_general(qs, cs, dn, preferred_element_type=jnp.float32)
    sv = jnp.where(mv_ref[0] != 0.0, sv, NEG_INF)
    ss = jnp.where(ms_ref[0] != 0.0, ss, NEG_INF)
    col = 0.5 * (jnp.max(sv, axis=1, keepdims=True)
                 + jnp.max(ss, axis=1, keepdims=True))                    # (M, 1)
    lane = lax.broadcasted_iota(jnp.int32, o_ref.shape, 1)                # (M, N)
    o_ref[...] += jnp.where(lane == n, col, 0.0)                          # one-hot column write


def _span_kernel(jq_ref, wjq_ref, bjq_ref, x_ref, m2_ref, band_ref, o_ref):
    # joint_query_linear -> 'bd,bld->bl' similarity -> Conv1d(1,1,K) x2 as a banded matmul
    jq = jnp.dot(jq_ref[0], wjq_ref[...],
                 preferred_element_type=jnp.float32) + bjq_ref[...]       # (1, D)
    sim = lax.dot_general(jq, x_ref[0], (((1,), (1,)), ((), ())),
                          preferred_element_type=jnp.float32)             # (1, L)
    out = jnp.dot(sim, band_ref[...], preferred_element_type=jnp.float32) # (1, 2L) [st | ed]
    o_ref[0] = jnp.where(m2_ref[0] != 0.0, out, NEG_INF)


# --------------------------------------------------------------------------- wrappers

def _attn_args(p):
    bf = jnp.bfloat16
    return (p['wq_t'].astype(bf), p['bq'], p['wk_t'].astype(bf), p['bk'],
            p['wv_t'].astype(bf), p['bv'], p['wo_t'].astype(bf), p['bo'],
            p['ln_g'], p['ln_b'])


def _attn_specs(D):
    return [_bcast_spec((D, D)), _bcast_spec((1, D)),
            _bcast_spec((D, D)), _bcast_spec((1, D)),
            _bcast_spec((D, D)), _bcast_spec((1, D)),
            _bcast_spec((D, D)), _bcast_spec((1, D)),
            _bcast_spec((1, D)), _bcast_spec((1, D))]


def encode_ctx(feat, mask, proj_p, enc_p, pos_p, n_heads):
    N, L, Din = feat.shape
    D = proj_p['w_t'].shape[1]
    mask_row = mask.reshape(N, 1, L).astype(jnp.float32)
    pos = pos_p['emb'][:L]
    kern = functools.partial(_encode_ctx_kernel, n_heads=n_heads)
    in_specs = ([pl.BlockSpec((1, L, Din), lambda i: (i, 0, 0)),
                 pl.BlockSpec((1, 1, L), lambda i: (i, 0, 0)),
                 _bcast_spec((1, Din)), _bcast_spec((1, Din)),
                 _bcast_spec((Din, D)), _bcast_spec((1, D)),
                 _bcast_spec((L, D)), _bcast_spec((1, D)), _bcast_spec((1, D))]
                + _attn_specs(D))
    return pl.pallas_call(
        kern,
        out_shape=jax.ShapeDtypeStruct((N, L, D), jnp.float32),
        grid=(N,),
        in_specs=in_specs,
        out_specs=pl.BlockSpec((1, L, D), lambda i: (i, 0, 0)),
        compiler_params=_cparams("parallel"),
    )(feat, mask_row, proj_p['g'], proj_p['b'],
      proj_p['w_t'].astype(jnp.bfloat16), proj_p['bias'],
      pos, pos_p['g'], pos_p['b'], *_attn_args(enc_p))


def encode_joint(enc_v, enc_s, mask, enc_p, pos_p, n_heads):
    N, L, D = enc_v.shape
    mask_row = mask.reshape(N, 1, L).astype(jnp.float32)
    pos = pos_p['emb'][:L]
    kern = functools.partial(_encode_joint_kernel, n_heads=n_heads)
    in_specs = ([pl.BlockSpec((1, L, D), lambda i: (i, 0, 0)),
                 pl.BlockSpec((1, L, D), lambda i: (i, 0, 0)),
                 pl.BlockSpec((1, 1, L), lambda i: (i, 0, 0)),
                 _bcast_spec((L, D)), _bcast_spec((1, D)), _bcast_spec((1, D))]
                + _attn_specs(D))
    return pl.pallas_call(
        kern,
        out_shape=jax.ShapeDtypeStruct((N, L, D), jnp.float32),
        grid=(N,),
        in_specs=in_specs,
        out_specs=pl.BlockSpec((1, L, D), lambda i: (i, 0, 0)),
        compiler_params=_cparams("parallel"),
    )(enc_v, enc_s, mask_row, pos, pos_p['g'], pos_p['b'], *_attn_args(enc_p))


def encode_query_modular(feat, mask, proj_p, enc_p, pos_p, mod_w, mod_b, n_heads):
    N, L, Din = feat.shape
    D = proj_p['w_t'].shape[1]
    mask_row = mask.reshape(N, 1, L).astype(jnp.float32)
    pos = pos_p['emb'][:L]
    kern = functools.partial(_encode_query_kernel, n_heads=n_heads)
    in_specs = ([pl.BlockSpec((1, L, Din), lambda i: (i, 0, 0)),
                 pl.BlockSpec((1, 1, L), lambda i: (i, 0, 0)),
                 _bcast_spec((1, Din)), _bcast_spec((1, Din)),
                 _bcast_spec((Din, D)), _bcast_spec((1, D)),
                 _bcast_spec((L, D)), _bcast_spec((1, D)), _bcast_spec((1, D))]
                + _attn_specs(D)
                + [_bcast_spec((3, D)), _bcast_spec((3, 1))])
    return pl.pallas_call(
        kern,
        out_shape=jax.ShapeDtypeStruct((N, 3, D), jnp.float32),
        grid=(N,),
        in_specs=in_specs,
        out_specs=pl.BlockSpec((1, 3, D), lambda i: (i, 0, 0)),
        compiler_params=_cparams("parallel"),
    )(feat, mask_row, proj_p['g'], proj_p['b'],
      proj_p['w_t'].astype(jnp.bfloat16), proj_p['bias'],
      pos, pos_p['g'], pos_p['b'], *_attn_args(enc_p), mod_w, mod_b)


def video_level_scores_fused(video_q, sub_q, enc_v, enc_s, video_mask, sub_mask):
    N, L, D = enc_v.shape
    M = video_q.shape[0]
    mv = video_mask.reshape(N, 1, L).astype(jnp.float32)
    ms = sub_mask.reshape(N, 1, L).astype(jnp.float32)
    in_specs = [_bcast_spec((M, D)), _bcast_spec((M, D)),
                pl.BlockSpec((1, L, D), lambda n: (n, 0, 0)),
                pl.BlockSpec((1, L, D), lambda n: (n, 0, 0)),
                pl.BlockSpec((1, 1, L), lambda n: (n, 0, 0)),
                pl.BlockSpec((1, 1, L), lambda n: (n, 0, 0))]
    return pl.pallas_call(
        _scores_kernel,
        out_shape=jax.ShapeDtypeStruct((M, N), jnp.float32),
        grid=(N,),
        in_specs=in_specs,
        out_specs=pl.BlockSpec((M, N), lambda n: (0, 0)),   # revisited accumulator
        compiler_params=_cparams("arbitrary"),
    )(video_q, sub_q, enc_v, enc_s, mv, ms)


def _banded_conv_matrix(conv_w, length):
    """Conv1d(1,1,K,pad=K//2,stride=1,bias=False) cross-correlation as an (L, L) banded matrix."""
    w = conv_w.reshape(-1)
    K = w.shape[0]
    pad = K // 2
    j = jnp.arange(length)[:, None]      # input position
    i = jnp.arange(length)[None, :]      # output position
    tap = j - i + pad
    valid = (tap >= 0) & (tap < K)
    return jnp.where(valid, w[jnp.clip(tap, 0, K - 1)], 0.0)


def span_logits(joint_query, x_feat, ctx_mask, wjq_t, bjq, conv_st, conv_ed):
    N, L, D = x_feat.shape
    # TODO(synk): at large L replace the (L, 2L) banded matmul with K shifted pltpu.roll adds.
    band = jnp.concatenate([_banded_conv_matrix(conv_st, L),
                            _banded_conv_matrix(conv_ed, L)], axis=1)            # (L, 2L)
    mask2 = jnp.concatenate([ctx_mask, ctx_mask], axis=1).astype(jnp.float32)
    mask2 = mask2.reshape(N, 1, 2 * L)
    jq = joint_query.reshape(N, 1, D)
    in_specs = [pl.BlockSpec((1, 1, D), lambda i: (i, 0, 0)),
                _bcast_spec((D, D)), _bcast_spec((1, D)),
                pl.BlockSpec((1, L, D), lambda i: (i, 0, 0)),
                pl.BlockSpec((1, 1, 2 * L), lambda i: (i, 0, 0)),
                _bcast_spec((L, 2 * L))]
    out = pl.pallas_call(
        _span_kernel,
        out_shape=jax.ShapeDtypeStruct((N, 1, 2 * L), jnp.float32),
        grid=(N,),
        in_specs=in_specs,
        out_specs=pl.BlockSpec((1, 1, 2 * L), lambda i: (i, 0, 0)),
        compiler_params=_cparams("parallel"),
    )(jq, wjq_t, bjq, x_feat, mask2, band)
    out = out.reshape(N, 2 * L)
    return out[:, :L], out[:, L:]


# --------------------------------------------------------------------------- glue (losses etc.)

def cross_entropy(logits, targets):
    logp = jax.nn.log_softmax(logits, axis=-1)
    nll = -jnp.take_along_axis(logp, targets[:, None].astype(jnp.int32), axis=1)[:, 0]
    return jnp.mean(nll)


def get_neg_scores(scores, scores_masked, cfg, key):
    bsz = scores.shape[0]
    idx = jnp.arange(bsz)
    sorted_idx = jnp.argsort(-scores_masked, axis=1)          # descending
    smin = 1
    smax = min(smin + cfg['hard_pool_size'], bsz) if cfg['use_hard_negative'] else bsz
    # TODO(synk): torch.randint sampling replaced with jax.random (different random stream).
    rand = jax.random.randint(key, (bsz,), smin, smax)
    sampled = sorted_idx[idx, rand]
    return scores[idx, sampled]


def get_ranking_loss(pos, neg, cfg):
    if cfg['ranking_loss_type'] == 'hinge':
        return jnp.sum(jnp.maximum(cfg['margin'] + neg - pos, 0.0)) / pos.shape[0]
    return jnp.sum(jnp.log1p(jnp.exp(neg - pos))) / pos.shape[0]


def video_level_loss(scores, cfg, rng):
    bsz = scores.shape[0]
    diag = jnp.arange(bsz)
    pos = scores[diag, diag]
    masked = scores.at[diag, diag].set(999.0)
    k1, k2 = jax.random.split(rng)
    neg_ctx = get_neg_scores(scores, masked, cfg, k1)
    neg_q = get_neg_scores(scores.T, masked.T, cfg, k2)
    return get_ranking_loss(pos, neg_ctx, cfg), get_ranking_loss(pos, neg_q, cfg)


# --------------------------------------------------------------------------- model

def xml_middle_forward(params, cfg, query_feat, query_mask, video_feat, video_mask,
                       sub_feat, sub_mask, tef_feat, tef_mask, st_ed_indices, rng):
    del tef_feat, tef_mask   # not used by XML_MIDDLE.forward
    nh = cfg['n_heads']
    # ---- encode_context (each encoder = one fused kernel, grid over batch) ----
    enc_video = encode_ctx(video_feat, video_mask, params['video_proj'],
                           params['video_enc'], params['cxt_pos'], nh)
    enc_sub = encode_ctx(sub_feat, sub_mask, params['sub_proj'],
                         params['sub_enc'], params['cxt_pos'], nh)
    enc_x = encode_joint(enc_video, enc_sub, video_mask,
                         params['joint_enc'], params['joint_pos'], nh)
    # ---- encode_query fused with modular query extraction ----
    mod = encode_query_modular(query_feat, query_mask, params['query_proj'],
                               params['query_enc'], params['query_pos'],
                               params['mod_w'], params['mod_b'], nh)
    video_query, sub_query, joint_query = mod[:, 0], mod[:, 1], mod[:, 2]
    # ---- video level scores (tiled over contexts, 0.5*(v+s) in kernel) ----
    q2ctx_scores = video_level_scores_fused(video_query, sub_query, enc_video, enc_sub,
                                            video_mask, sub_mask)
    # ---- span prediction (Conv1d as banded matmul, st/ed stacked output) ----
    st_prob, ed_prob = span_logits(joint_query, enc_x, video_mask,
                                   params['jq_w_t'], params['jq_b'],
                                   params['conv_st'], params['conv_ed'])
    # ---- losses ----
    loss_st_ed = 0.0
    if cfg['lw_st_ed'] != 0:
        loss_st = cross_entropy(st_prob, st_ed_indices[:, 0])
        loss_ed = cross_entropy(ed_prob, st_ed_indices[:, 1])
        loss_st_ed = loss_st + loss_ed
    loss_neg_ctx, loss_neg_q = 0.0, 0.0
    if cfg['lw_neg_ctx'] != 0 or cfg['lw_neg_q'] != 0:
        loss_neg_ctx, loss_neg_q = video_level_loss(q2ctx_scores, cfg, rng)
    loss_st_ed = cfg['lw_st_ed'] * loss_st_ed
    loss_neg_ctx = cfg['lw_neg_ctx'] * loss_neg_ctx
    loss_neg_q = cfg['lw_neg_q'] * loss_neg_q
    loss = loss_st_ed + loss_neg_ctx + loss_neg_q
    # Return arrays (not float()) so this stays jit-compatible.
    return loss, {'loss_st_ed': loss_st_ed, 'loss_neg_ctx': loss_neg_ctx,
                  'loss_neg_q': loss_neg_q, 'loss_overall': loss}


# --------------------------------------------------------------------------- params

def init_params(key, cfg):
    D = cfg['hidden_size']
    std = cfg['initializer_range']
    keys = iter(jax.random.split(key, 64))

    def nrm(shape):
        return jax.random.normal(next(keys), shape, jnp.float32) * std

    def ln(d):
        return dict(g=jnp.ones((1, d), jnp.float32), b=jnp.zeros((1, d), jnp.float32))

    def lin(din, dout):  # weights stored transposed for x @ W^T; biases zero per re_init
        return dict(w_t=nrm((dout, din)).T, bias=jnp.zeros((1, dout), jnp.float32))

    def proj(din):
        p = ln(din)
        p.update(lin(din, D))
        return p

    def posenc(max_len):
        return dict(emb=nrm((max_len, D)), **ln(D))

    def bert_attn():
        return dict(
            wq_t=nrm((D, D)).T, bq=jnp.zeros((1, D), jnp.float32),
            wk_t=nrm((D, D)).T, bk=jnp.zeros((1, D), jnp.float32),
            wv_t=nrm((D, D)).T, bv=jnp.zeros((1, D), jnp.float32),
            wo_t=nrm((D, D)).T, bo=jnp.zeros((1, D), jnp.float32),
            ln_g=jnp.ones((1, D), jnp.float32), ln_b=jnp.zeros((1, D), jnp.float32))

    K = cfg['conv_kernel_size']
    bound = 1.0 / math.sqrt(K)   # Conv1d(1,1,K) kaiming-uniform bound

    def conv():
        return jax.random.uniform(next(keys), (1, K), jnp.float32, -bound, bound)

    return dict(
        query_pos=posenc(cfg['max_desc_l']),
        cxt_pos=posenc(cfg['max_ctx_l']),
        joint_pos=posenc(cfg['max_ctx_l']),
        query_proj=proj(cfg['query_input_size']),
        video_proj=proj(cfg['visual_input_size']),
        sub_proj=proj(cfg['sub_input_size']),
        query_enc=bert_attn(), video_enc=bert_attn(),
        sub_enc=bert_attn(), joint_enc=bert_attn(),
        mod_w=nrm((3, D)), mod_b=jnp.zeros((3, 1), jnp.float32),   # nn.Linear(D, 3) weight/bias
        jq_w_t=nrm((D, D)).T, jq_b=jnp.zeros((1, D), jnp.float32),
        conv_st=conv(), conv_ed=conv(),
    )


# --------------------------------------------------------------------------- main

if __name__ == "__main__":
    cfg = dict(hidden_size=32, n_heads=4, max_desc_l=8, max_ctx_l=16,
               query_input_size=24, visual_input_size=40, sub_input_size=28,
               conv_kernel_size=5, conv_stride=1, initializer_range=0.02,
               lw_st_ed=1.0, lw_neg_ctx=1.0, lw_neg_q=1.0,
               margin=0.1, ranking_loss_type='hinge',
               use_hard_negative=False, hard_pool_size=20)

    key = jax.random.PRNGKey(0)
    kp, kq, kv, ks, kr = jax.random.split(key, 5)
    params = init_params(kp, cfg)

    N, Lq, Lv = 2, cfg['max_desc_l'], cfg['max_ctx_l']
    query_feat = jax.random.normal(kq, (N, Lq, cfg['query_input_size']), jnp.float32)
    video_feat = jax.random.normal(kv, (N, Lv, cfg['visual_input_size']), jnp.float32)
    sub_feat = jax.random.normal(ks, (N, Lv, cfg['sub_input_size']), jnp.float32)
    query_mask = jnp.array([[1.0] * 8, [1.0] * 6 + [0.0] * 2], jnp.float32)
    video_mask = jnp.array([[1.0] * 16, [1.0] * 12 + [0.0] * 4], jnp.float32)
    sub_mask = video_mask
    tef_feat = jnp.zeros((N, Lv, 2), jnp.float32)
    tef_mask = video_mask
    st_ed_indices = jnp.array([[2, 10], [1, 8]], jnp.int32)

    loss, loss_dict = xml_middle_forward(params, cfg, query_feat, query_mask,
                                         video_feat, video_mask, sub_feat, sub_mask,
                                         tef_feat, tef_mask, st_ed_indices, kr)
    jax.block_until_ready(loss)
    print("KERNEL_OK")
</pallas_src>

<mosaic_0001>
module attributes {stable_mosaic.version = 11 : i64} {
  func.func @_probe_kernel(%arg0: i32, %arg1: memref<8x128xf32, #tpu.memory_space<vmem>>, %arg2: memref<8x128xf32, #tpu.memory_space<vmem>>) attributes {dimension_semantics = [#tpu.dimension_semantics<arbitrary>], iteration_bounds = array<i64: 2>, scalar_prefetch = 0 : i64, scratch_operands = 0 : i64, tpu.core_type = #tpu.core_type<tc>, window_params = [{pipeline_mode = #tpu.pipeline_mode<synchronous>, transform_indices = @transform_0, window_bounds = array<i64: 8, 128>}, {transform_indices = @transform_1, window_bounds = array<i64: 8, 128>}]} {
    %c0 = arith.constant 0 : index
    %c0_0 = arith.constant 0 : index
    %0 = vector.load %arg1[%c0, %c0_0] : memref<8x128xf32, #tpu.memory_space<vmem>>, vector<8x128xf32>
    %cst = arith.constant 1.000000e+00 : f32
    %1 = vector.broadcast %cst : f32 to vector<8x128xf32>
    %2 = arith.addf %0, %1 : vector<8x128xf32>
    %c0_1 = arith.constant 0 : index
    %c0_2 = arith.constant 0 : index
    %3 = vector.load %arg2[%c0_1, %c0_2] : memref<8x128xf32, #tpu.memory_space<vmem>>, vector<8x128xf32>
    tpu.vector_store %arg2[%c0_1, %c0_2], %2 {strides = array<i32>} : memref<8x128xf32, #tpu.memory_space<vmem>>, vector<8x128xf32>,
    return
  }
  func.func @transform_0(%arg0: i32) -> (i32, i32) {
    %c0_i32 = arith.constant 0 : i32
    %c0_i32_0 = arith.constant 0 : i32
    %c0_i32_1 = arith.constant 0 : i32
    return %c0_i32, %c0_i32_0 : i32, i32
  }
  func.func @transform_1(%arg0: i32) -> (i32, i32) {
    %c0_i32 = arith.constant 0 : i32
    %c0_i32_0 = arith.constant 0 : i32
    return %arg0, %c0_i32 : i32, i32
  }
}

module attributes {stable_mosaic.version = 11 : i64} {
  func.func @_encode_ctx_kernel(%arg0: i32, %arg1: memref<1x16x40xf32, #tpu.memory_space<vmem>>, %arg2: memref<1x1x16xf32, #tpu.memory_space<vmem>>, %arg3: memref<1x40xf32, #tpu.memory_space<vmem>>, %arg4: memref<1x40xf32, #tpu.memory_space<vmem>>, %arg5: memref<40x32xbf16, #tpu.memory_space<vmem>>, %arg6: memref<1x32xf32, #tpu.memory_space<vmem>>, %arg7: memref<16x32xf32, #tpu.memory_space<vmem>>, %arg8: memref<1x32xf32, #tpu.memory_space<vmem>>, %arg9: memref<1x32xf32, #tpu.memory_space<vmem>>, %arg10: memref<32x32xbf16, #tpu.memory_space<vmem>>, %arg11: memref<1x32xf32, #tpu.memory_space<vmem>>, %arg12: memref<32x32xbf16, #tpu.memory_space<vmem>>, %arg13: memref<1x32xf32, #tpu.memory_space<vmem>>, %arg14: memref<32x32xbf16, #tpu.memory_space<vmem>>, %arg15: memref<1x32xf32, #tpu.memory_space<vmem>>, %arg16: memref<32x32xbf16, #tpu.memory_space<vmem>>, %arg17: memref<1x32xf32, #tpu.memory_space<vmem>>, %arg18: memref<1x32xf32, #tpu.memory_space<vmem>>, %arg19: memref<1x32xf32, #tpu.memory_space<vmem>>, %arg20: memref<1x16x32xf32, #tpu.memory_space<vmem>>) attributes {dimension_semantics = [#tpu.dimension_semantics<parallel>], iteration_bounds = array<i64: 2>, scalar_prefetch = 0 : i64, scratch_operands = 0 : i64, tpu.core_type = #tpu.core_type<tc>, window_params = [{transform_indices = @transform_0, window_bounds = array<i64: 1, 16, 40>}, {transform_indices = @transform_1, window_bounds = array<i64: 1, 1, 16>}, {pipeline_mode = #tpu.pipeline_mode<synchronous>, transform_indices = @transform_2, window_bounds = array<i64: 1, 40>}, {pipeline_mode = #tpu.pipeline_mode<synchronous>, transform_indices = @transform_3, window_bounds = array<i64: 1, 40>}, {pipeline_mode = #tpu.pipeline_mode<synchronous>, transform_indices = @transform_4, window_bounds = array<i64: 40, 32>}, {pipeline_mode = #tpu.pipeline_mode<synchronous>, transform_indices = @transform_5, window_bounds = array<i64: 1, 32>}, {pipeline_mode = #tpu.pipeline_mode<synchronous>, transform_indices = @transform_6, window_bounds = array<i64: 16, 32>}, {pipeline_mode = #tpu.pipeline_mode<synchronous>, transform_indices = @transform_7, window_bounds = array<i64: 1, 32>}, {pipeline_mode = #tpu.pipeline_mode<synchronous>, transform_indices = @transform_8, window_bounds = array<i64: 1, 32>}, {pipeline_mode = #tpu.pipeline_mode<synchronous>, transform_indices = @transform_9, window_bounds = array<i64: 32, 32>}, {pipeline_mode = #tpu.pipeline_mode<synchronous>, transform_indices = @transform_10, window_bounds = array<i64: 1, 32>}, {pipeline_mode = #tpu.pipeline_mode<synchronous>, transform_indices = @transform_11, window_bounds = array<i64: 32, 32>}, {pipeline_mode = #tpu.pipeline_mode<synchronous>, transform_indices = @transform_12, window_bounds = array<i64: 1, 32>}, {pipeline_mode = #tpu.pipeline_mode<synchronous>, transform_indices = @transform_13, window_bounds = array<i64: 32, 32>}, {pipeline_mode = #tpu.pipeline_mode<synchronous>, transform_indices = @transform_14, window_bounds = array<i64: 1, 32>}, {pipeline_mode = #tpu.pipeline_mode<synchronous>, transform_indices = @transform_15, window_bounds = array<i64: 32, 32>}, {pipeline_mode = #tpu.pipeline_mode<synchronous>, transform_indices = @transform_16, window_bounds = array<i64: 1, 32>}, {pipeline_mode = #tpu.pipeline_mode<synchronous>, transform_indices = @transform_17, window_bounds = array<i64: 1, 32>}, {pipeline_mode = #tpu.pipeline_mode<synchronous>, transform_indices = @transform_18, window_bounds = array<i64: 1, 32>}, {transform_indices = @transform_19, window_bounds = array<i64: 1, 16, 32>}]} {
    %c0 = arith.constant 0 : index
    %c0_0 = arith.constant 0 : index
    %c0_1 = arith.constant 0 : index
    %0 = vector.load %arg1[%c0, %c0_0, %c0_1] : memref<1x16x40xf32, #tpu.memory_space<vmem>>, vector<1x16x40xf32>
    %1 = vector.shape_cast %0 : vector<1x16x40xf32> to vector<16x40xf32>
    %c0_2 = arith.constant 0 : index
    %c0_3 = arith.constant 0 : index
    %2 = vector.load %arg3[%c0_2, %c0_3] : memref<1x40xf32, #tpu.memory_space<vmem>>, vector<1x40xf32>
    %c0_4 = arith.constant 0 : index
    %c0_5 = arith.constant 0 : index
    %3 = vector.load %arg4[%c0_4, %c0_5] : memref<1x40xf32, #tpu.memory_space<vmem>>, vector<1x40xf32>
    %cst = arith.constant dense<0.000000e+00> : vector<16xf32>
    %4 = vector.multi_reduction <add>, %1, %cst [1] : vector<16x40xf32> to vector<16xf32>
    %5 = vector.shape_cast %4 : vector<16xf32> to vector<16x1xf32>
    %cst_6 = arith.constant 4.000000e+01 : f32
    %6 = vector.broadcast %cst_6 : f32 to vector<16x1xf32>
    %7 = arith.divf %5, %6 : vector<16x1xf32>
    %8 = vector.broadcast %7 : vector<16x1xf32> to vector<16x40xf32>
    %9 = arith.subf %1, %8 : vector<16x40xf32>
    %10 = arith.mulf %9, %9 : vector<16x40xf32>
    %cst_7 = arith.constant dense<0.000000e+00> : vector<16xf32>
    %11 = vector.multi_reduction <add>, %10, %cst_7 [1] : vector<16x40xf32> to vector<16xf32>
    %12 = vector.shape_cast %11 : vector<16xf32> to vector<16x1xf32>
    %cst_8 = arith.constant 4.000000e+01 : f32
    %13 = vector.broadcast %cst_8 : f32 to vector<16x1xf32>
    %14 = arith.divf %12, %13 : vector<16x1xf32>
    %15 = vector.broadcast %7 : vector<16x1xf32> to vector<16x40xf32>
    %16 = arith.subf %1, %15 : vector<16x40xf32>
    %cst_9 = arith.constant 9.99999974E-6 : f32
    %17 = vector.broadcast %cst_9 : f32 to vector<16x1xf32>
    %18 = arith.addf %14, %17 : vector<16x1xf32>
    %19 = math.rsqrt %18 : vector<16x1xf32>
    %20 = vector.broadcast %19 : vector<16x1xf32> to vector<16x40xf32>
    %21 = arith.mulf %16, %20 : vector<16x40xf32>
    %22 = vector.broadcast %2 : vector<1x40xf32> to vector<16x40xf32>
    %23 = arith.mulf %21, %22 : vector<16x40xf32>
    %24 = vector.broadcast %3 : vector<1x40xf32> to vector<16x40xf32>
    %25 = arith.addf %23, %24 : vector<16x40xf32>
    %26 = arith.truncf %25 : vector<16x40xf32> to vector<16x40xbf16>
    %c0_10 = arith.constant 0 : index
    %c0_11 = arith.constant 0 : index
    %27 = vector.load %arg5[%c0_10, %c0_11] : memref<40x32xbf16, #tpu.memory_space<vmem>>, vector<40x32xbf16>
    %cst_12 = arith.constant dense<0.000000e+00> : vector<16x32xf32>
    %28 = tpu.matmul %26, %27, %cst_12 {dimension_numbers = #tpu.dot_dimension_numbers<[1], [0], [0], [1], [0, 0, 1, 1], [], []>} : vector<16x40xbf16>, vector<40x32xbf16>, vector<16x32xf32> -> vector<16x32xf32>
    %c0_13 = arith.constant 0 : index
    %c0_14 = arith.constant 0 : index
    %29 = vector.load %arg6[%c0_13, %c0_14] : memref<1x32xf32, #tpu.memory_space<vmem>>, vector<1x32xf32>
    %30 = vector.broadcast %29 : vector<1x32xf32> to vector<16x32xf32>
    %31 = arith.addf %28, %30 : vector<16x32xf32>
    %cst_15 = arith.constant 0.000000e+00 : f32
    %32 = vector.broadcast %cst_15 : f32 to vector<16x32xf32>
    %33 = arith.maximumf %31, %32 : vector<16x32xf32>
    %c0_16 = arith.constant 0 : index
    %c0_17 = arith.constant 0 : index
    %34 = vector.load %arg7[%c0_16, %c0_17] : memref<16x32xf32, #tpu.memory_space<vmem>>, vector<16x32xf32>
    %35 = arith.addf %33, %34 : vector<16x32xf32>
    %c0_18 = arith.constant 0 : index
    %c0_19 = arith.constant 0 : index
    %36 = vector.load %arg8[%c0_18, %c0_19] : memref<1x32xf32, #tpu.memory_space<vmem>>, vector<1x32xf32>
    %c0_20 = arith.constant 0 : index
    %c0_21 = arith.constant 0 : index
    %37 = vector.load %arg9[%c0_20, %c0_21] : memref<1x32xf32, #tpu.memory_space<vmem>>, vector<1x32xf32>
    %cst_22 = arith.constant dense<0.000000e+00> : vector<16xf32>
    %38 = vector.multi_reduction <add>, %35, %cst_22 [1] : vector<16x32xf32> to vector<16xf32>
    %39 = vector.shape_cast %38 : vector<16xf32> to vector<16x1xf32>
    %cst_23 = arith.constant 3.200000e+01 : f32
    %40 = vector.broadcast %cst_23 : f32 to vector<16x1xf32>
    %41 = arith.divf %39, %40 : vector<16x1xf32>
    %42 = vector.broadcast %41 : vector<16x1xf32> to vector<16x32xf32>
    %43 = arith.subf %35, %42 : vector<16x32xf32>
    %44 = arith.mulf %43, %43 : vector<16x32xf32>
    %cst_24 = arith.constant dense<0.000000e+00> : vector<16xf32>
    %45 = vector.multi_reduction <add>, %44, %cst_24 [1] : vector<16x32xf32> to vector<16xf32>
    %46 = vector.shape_cast %45 : vector<16xf32> to vector<16x1xf32>
    %cst_25 = arith.constant 3.200000e+01 : f32
    %47 = vector.broadcast %cst_25 : f32 to vector<16x1xf32>
    %48 = arith.divf %46, %47 : vector<16x1xf32>
    %49 = vector.broadcast %41 : vector<16x1xf32> to vector<16x32xf32>
    %50 = arith.subf %35, %49 : vector<16x32xf32>
    %cst_26 = arith.constant 9.99999974E-6 : f32
    %51 = vector.broadcast %cst_26 : f32 to vector<16x1xf32>
    %52 = arith.addf %48, %51 : vector<16x1xf32>
    %53 = math.rsqrt %52 : vector<16x1xf32>
    %54 = vector.broadcast %53 : vector<16x1xf32> to vector<16x32xf32>
    %55 = arith.mulf %50, %54 : vector<16x32xf32>
    %56 = vector.broadcast %36 : vector<1x32xf32> to vector<16x32xf32>
    %57 = arith.mulf %55, %56 : vector<16x32xf32>
    %58 = vector.broadcast %37 : vector<1x32xf32> to vector<16x32xf32>
    %59 = arith.addf %57, %58 : vector<16x32xf32>
    %c0_27 = arith.constant 0 : index
    %c0_28 = arith.constant 0 : index
    %c0_29 = arith.constant 0 : index
    %60 = vector.load %arg2[%c0_27, %c0_28, %c0_29] : memref<1x1x16xf32, #tpu.memory_space<vmem>>, vector<1x1x16xf32>
    %61 = vector.shape_cast %60 : vector<1x1x16xf32> to vector<1x16xf32>
    %cst_30 = arith.constant 1.000000e+00 : f32
    %62 = vector.broadcast %cst_30 : f32 to vector<1x16xf32>
    %63 = arith.subf %62, %61 : vector<1x16xf32>
    %cst_31 = arith.constant -1.000000e+04 : f32
    %64 = vector.broadcast %cst_31 : f32 to vector<1x16xf32>
    %65 = arith.mulf %63, %64 : vector<1x16xf32>
    %c0_32 = arith.constant 0 : index
    %c0_33 = arith.constant 0 : index
    %66 = vector.load %arg10[%c0_32, %c0_33] : memref<32x32xbf16, #tpu.memory_space<vmem>>, vector<32x32xbf16>
    %c0_34 = arith.constant 0 : index
    %c0_35 = arith.constant 0 : index
    %67 = vector.load %arg11[%c0_34, %c0_35] : memref<1x32xf32, #tpu.memory_space<vmem>>, vector<1x32xf32>
    %c0_36 = arith.constant 0 : index
    %c0_37 = arith.constant 0 : index
    %68 = vector.load %arg12[%c0_36, %c0_37] : memref<32x32xbf16, #tpu.memory_space<vmem>>, vector<32x32xbf16>
    %c0_38 = arith.constant 0 : index
    %c0_39 = arith.constant 0 : index
    %69 = vector.load %arg13[%c0_38, %c0_39] : memref<1x32xf32, #tpu.memory_space<vmem>>, vector<1x32xf32>
    %c0_40 = arith.constant 0 : index
    %c0_41 = arith.constant 0 : index
    %70 = vector.load %arg14[%c0_40, %c0_41] : memref<32x32xbf16, #tpu.memory_space<vmem>>, vector<32x32xbf16>
    %c0_42 = arith.constant 0 : index
    %c0_43 = arith.constant 0 : index
    %71 = vector.load %arg15[%c0_42, %c0_43] : memref<1x32xf32, #tpu.memory_space<vmem>>, vector<1x32xf32>
    %c0_44 = arith.constant 0 : index
    %c0_45 = arith.constant 0 : index
    %72 = vector.load %arg16[%c0_44, %c0_45] : memref<32x32xbf16, #tpu.memory_space<vmem>>, vector<32x32xbf16>
    %c0_46 = arith.constant 0 : index
    %c0_47 = arith.constant 0 : index
    %73 = vector.load %arg17[%c0_46, %c0_47] : memref<1x32xf32, #tpu.memory_space<vmem>>, vector<1x32xf32>
    %c0_48 = arith.constant 0 : index
    %c0_49 = arith.constant 0 : index
    %74 = vector.load %arg18[%c0_48, %c0_49] : memref<1x32xf32, #tpu.memory_space<vmem>>, vector<1x32xf32>
    %c0_50 = arith.constant 0 : index
    %c0_51 = arith.constant 0 : index
    %75 = vector.load %arg19[%c0_50, %c0_51] : memref<1x32xf32, #tpu.memory_space<vmem>>, vector<1x32xf32>
    %76 = arith.truncf %59 : vector<16x32xf32> to vector<16x32xbf16>
    %cst_52 = arith.constant dense<0.000000e+00> : vector<16x32xf32>
    %77 = tpu.matmul %76, %66, %cst_52 {dimension_numbers = #tpu.dot_dimension_numbers<[1], [0], [0], [1], [0, 0, 1, 1], [], []>} : vector<16x32xbf16>, vector<32x32xbf16>, vector<16x32xf32> -> vector<16x32xf32>
    %78 = vector.broadcast %67 : vector<1x32xf32> to vector<16x32xf32>
    %79 = arith.addf %77, %78 : vector<16x32xf32>
    %cst_53 = arith.constant dense<0.000000e+00> : vector<16x32xf32>
    %80 = tpu.matmul %76, %68, %cst_53 {dimension_numbers = #tpu.dot_dimension_numbers<[1], [0], [0], [1], [0, 0, 1, 1], [], []>} : vector<16x32xbf16>, vector<32x32xbf16>, vector<16x32xf32> -> vector<16x32xf32>
    %81 = vector.broadcast %69 : vector<1x32xf32> to vector<16x32xf32>
    %82 = arith.addf %80, %81 : vector<16x32xf32>
    %cst_54 = arith.constant dense<0.000000e+00> : vector<16x32xf32>
    %83 = tpu.matmul %76, %70, %cst_54 {dimension_numbers = #tpu.dot_dimension_numbers<[1], [0], [0], [1], [0, 0, 1, 1], [], []>} : vector<16x32xbf16>, vector<32x32xbf16>, vector<16x32xf32> -> vector<16x32xf32>
    %84 = vector.broadcast %71 : vector<1x32xf32> to vector<16x32xf32>
    %85 = arith.addf %83, %84 : vector<16x32xf32>
    %86 = vector.extract_strided_slice %79 {offsets = [0, 0], sizes = [16, 8], strides = [1, 1]} : vector<16x32xf32> to vector<16x8xf32>
    %87 = arith.truncf %86 : vector<16x8xf32> to vector<16x8xbf16>
    %88 = vector.extract_strided_slice %82 {offsets = [0, 0], sizes = [16, 8], strides = [1, 1]} : vector<16x32xf32> to vector<16x8xf32>
    %89 = arith.truncf %88 : vector<16x8xf32> to vector<16x8xbf16>
    %90 = vector.extract_strided_slice %85 {offsets = [0, 0], sizes = [16, 8], strides = [1, 1]} : vector<16x32xf32> to vector<16x8xf32>
    %91 = arith.truncf %90 : vector<16x8xf32> to vector<16x8xbf16>
    %cst_55 = arith.constant dense<0.000000e+00> : vector<16x16xf32>
    %92 = tpu.matmul %87, %89, %cst_55 {dimension_numbers = #tpu.dot_dimension_numbers<[1], [1], [0], [0], [0, 0, 1, 0], [], []>} : vector<16x8xbf16>, vector<16x8xbf16>, vector<16x16xf32> -> vector<16x16xf32>
    %cst_56 = arith.constant 0.353553385 : f32
    %93 = vector.broadcast %cst_56 : f32 to vector<16x16xf32>
    %94 = arith.mulf %92, %93 : vector<16x16xf32>
    %95 = vector.broadcast %65 : vector<1x16xf32> to vector<16x16xf32>
    %96 = arith.addf %94, %95 : vector<16x16xf32>
    %cst_57 = arith.constant dense<0xFF800000> : vector<16xf32>
    %97 = vector.multi_reduction <maximumf>, %96, %cst_57 [1] : vector<16x16xf32> to vector<16xf32>
    %98 = vector.shape_cast %97 : vector<16xf32> to vector<16x1xf32>
    %99 = vector.broadcast %98 : vector<16x1xf32> to vector<16x16xf32>
    %100 = arith.subf %96, %99 : vector<16x16xf32>
    %101 = math.exp %100 : vector<16x16xf32>
    %cst_58 = arith.constant dense<0.000000e+00> : vector<16xf32>
    %102 = vector.multi_reduction <add>, %101, %cst_58 [1] : vector<16x16xf32> to vector<16xf32>
    %103 = vector.shape_cast %102 : vector<16xf32> to vector<16x1xf32>
    %104 = tpu.reciprocal %103 {approx = true} : vector<16x1xf32> -> vector<16x1xf32>
    %105 = vector.broadcast %104 : vector<16x1xf32> to vector<16x16xf32>
    %106 = arith.mulf %101, %105 : vector<16x16xf32>
    %107 = arith.truncf %106 : vector<16x16xf32> to vector<16x16xbf16>
    %cst_59 = arith.constant dense<0.000000e+00> : vector<16x8xf32>
    %108 = tpu.matmul %107, %91, %cst_59 {dimension_numbers = #tpu.dot_dimension_numbers<[1], [0], [0], [1], [0, 0, 1, 1], [], []>} : vector<16x16xbf16>, vector<16x8xbf16>, vector<16x8xf32> -> vector<16x8xf32>
    %109 = vector.extract_strided_slice %79 {offsets = [0, 8], sizes = [16, 8], strides = [1, 1]} : vector<16x32xf32> to vector<16x8xf32>
    %110 = arith.truncf %109 : vector<16x8xf32> to vector<16x8xbf16>
    %111 = vector.extract_strided_slice %82 {offsets = [0, 8], sizes = [16, 8], strides = [1, 1]} : vector<16x32xf32> to vector<16x8xf32>
    %112 = arith.truncf %111 : vector<16x8xf32> to vector<16x8xbf16>
    %113 = vector.extract_strided_slice %85 {offsets = [0, 8], sizes = [16, 8], strides = [1, 1]} : vector<16x32xf32> to vector<16x8xf32>
    %114 = arith.truncf %113 : vector<16x8xf32> to vector<16x8xbf16>
    %cst_60 = arith.constant dense<0.000000e+00> : vector<16x16xf32>
    %115 = tpu.matmul %110, %112, %cst_60 {dimension_numbers = #tpu.dot_dimension_numbers<[1], [1], [0], [0], [0, 0, 1, 0], [], []>} : vector<16x8xbf16>, vector<16x8xbf16>, vector<16x16xf32> -> vector<16x16xf32>
    %cst_61 = arith.constant 0.353553385 : f32
    %116 = vector.broadcast %cst_61 : f32 to vector<16x16xf32>
    %117 = arith.mulf %115, %116 : vector<16x16xf32>
    %118 = vector.broadcast %65 : vector<1x16xf32> to vector<16x16xf32>
    %119 = arith.addf %117, %118 : vector<16x16xf32>
    %cst_62 = arith.constant dense<0xFF800000> : vector<16xf32>
    %120 = vector.multi_reduction <maximumf>, %119, %cst_62 [1] : vector<16x16xf32> to vector<16xf32>
    %121 = vector.shape_cast %120 : vector<16xf32> to vector<16x1xf32>
    %122 = vector.broadcast %121 : vector<16x1xf32> to vector<16x16xf32>
    %123 = arith.subf %119, %122 : vector<16x16xf32>
    %124 = math.exp %123 : vector<16x16xf32>
    %cst_63 = arith.constant dense<0.000000e+00> : vector<16xf32>
    %125 = vector.multi_reduction <add>, %124, %cst_63 [1] : vector<16x16xf32> to vector<16xf32>
    %126 = vector.shape_cast %125 : vector<16xf32> to vector<16x1xf32>
    %127 = tpu.reciprocal %126 {approx = true} : vector<16x1xf32> -> vector<16x1xf32>
    %128 = vector.broadcast %127 : vector<16x1xf32> to vector<16x16xf32>
    %129 = arith.mulf %124, %128 : vector<16x16xf32>
    %130 = arith.truncf %129 : vector<16x16xf32> to vector<16x16xbf16>
    %cst_64 = arith.constant dense<0.000000e+00> : vector<16x8xf32>
    %131 = tpu.matmul %130, %114, %cst_64 {dimension_numbers = #tpu.dot_dimension_numbers<[1], [0], [0], [1], [0, 0, 1, 1], [], []>} : vector<16x16xbf16>, vector<16x8xbf16>, vector<16x8xf32> -> vector<16x8xf32>
    %132 = vector.extract_strided_slice %79 {offsets = [0, 16], sizes = [16, 8], strides = [1, 1]} : vector<16x32xf32> to vector<16x8xf32>
    %133 = arith.truncf %132 : vector<16x8xf32> to vector<16x8xbf16>
    %134 = vector.extract_strided_slice %82 {offsets = [0, 16], sizes = [16, 8], strides = [1, 1]} : vector<16x32xf32> to vector<16x8xf32>
    %135 = arith.truncf %134 : vector<16x8xf32> to vector<16x8xbf16>
    %136 = vector.extract_strided_slice %85 {offsets = [0, 16], sizes = [16, 8], strides = [1, 1]} : vector<16x32xf32> to vector<16x8xf32>
    %137 = arith.truncf %136 : vector<16x8xf32> to vector<16x8xbf16>
    %cst_65 = arith.constant dense<0.000000e+00> : vector<16x16xf32>
    %138 = tpu.matmul %133, %135, %cst_65 {dimension_numbers = #tpu.dot_dimension_numbers<[1], [1], [0], [0], [0, 0, 1, 0], [], []>} : vector<16x8xbf16>, vector<16x8xbf16>, vector<16x16xf32> -> vector<16x16xf32>
    %cst_66 = arith.constant 0.353553385 : f32
    %139 = vector.broadcast %cst_66 : f32 to vector<16x16xf32>
    %140 = arith.mulf %138, %139 : vector<16x16xf32>
    %141 = vector.broadcast %65 : vector<1x16xf32> to vector<16x16xf32>
    %142 = arith.addf %140, %141 : vector<16x16xf32>
    %cst_67 = arith.constant dense<0xFF800000> : vector<16xf32>
    %143 = vector.multi_reduction <maximumf>, %142, %cst_67 [1] : vector<16x16xf32> to vector<16xf32>
    %144 = vector.shape_cast %143 : vector<16xf32> to vector<16x1xf32>
    %145 = vector.broadcast %144 : vector<16x1xf32> to vector<16x16xf32>
    %146 = arith.subf %142, %145 : vector<16x16xf32>
    %147 = math.exp %146 : vector<16x16xf32>
    %cst_68 = arith.constant dense<0.000000e+00> : vector<16xf32>
    %148 = vector.multi_reduction <add>, %147, %cst_68 [1] : vector<16x16xf32> to vector<16xf32>
    %149 = vector.shape_cast %148 : vector<16xf32> to vector<16x1xf32>
    %150 = tpu.reciprocal %149 {approx = true} : vector<16x1xf32> -> vector<16x1xf32>
    %151 = vector.broadcast %150 : vector<16x1xf32> to vector<16x16xf32>
    %152 = arith.mulf %147, %151 : vector<16x16xf32>
    %153 = arith.truncf %152 : vector<16x16xf32> to vector<16x16xbf16>
    %cst_69 = arith.constant dense<0.000000e+00> : vector<16x8xf32>
    %154 = tpu.matmul %153, %137, %cst_69 {dimension_numbers = #tpu.dot_dimension_numbers<[1], [0], [0], [1], [0, 0, 1, 1], [], []>} : vector<16x16xbf16>, vector<16x8xbf16>, vector<16x8xf32> -> vector<16x8xf32>
    %155 = vector.extract_strided_slice %79 {offsets = [0, 24], sizes = [16, 8], strides = [1, 1]} : vector<16x32xf32> to vector<16x8xf32>
    %156 = arith.truncf %155 : vector<16x8xf32> to vector<16x8xbf16>
    %157 = vector.extract_strided_slice %82 {offsets = [0, 24], sizes = [16, 8], strides = [1, 1]} : vector<16x32xf32> to vector<16x8xf32>
    %158 = arith.truncf %157 : vector<16x8xf32> to vector<16x8xbf16>
    %159 = vector.extract_strided_slice %85 {offsets = [0, 24], sizes = [16, 8], strides = [1, 1]} : vector<16x32xf32> to vector<16x8xf32>
    %160 = arith.truncf %159 : vector<16x8xf32> to vector<16x8xbf16>
    %cst_70 = arith.constant dense<0.000000e+00> : vector<16x16xf32>
    %161 = tpu.matmul %156, %158, %cst_70 {dimension_numbers = #tpu.dot_dimension_numbers<[1], [1], [0], [0], [0, 0, 1, 0], [], []>} : vector<16x8xbf16>, vector<16x8xbf16>, vector<16x16xf32> -> vector<16x16xf32>
    %cst_71 = arith.constant 0.353553385 : f32
    %162 = vector.broadcast %cst_71 : f32 to vector<16x16xf32>
    %163 = arith.mulf %161, %162 : vector<16x16xf32>
    %164 = vector.broadcast %65 : vector<1x16xf32> to vector<16x16xf32>
    %165 = arith.addf %163, %164 : vector<16x16xf32>
    %cst_72 = arith.constant dense<0xFF800000> : vector<16xf32>
    %166 = vector.multi_reduction <maximumf>, %165, %cst_72 [1] : vector<16x16xf32> to vector<16xf32>
    %167 = vector.shape_cast %166 : vector<16xf32> to vector<16x1xf32>
    %168 = vector.broadcast %167 : vector<16x1xf32> to vector<16x16xf32>
    %169 = arith.subf %165, %168 : vector<16x16xf32>
    %170 = math.exp %169 : vector<16x16xf32>
    %cst_73 = arith.constant dense<0.000000e+00> : vector<16xf32>
    %171 = vector.multi_reduction <add>, %170, %cst_73 [1] : vector<16x16xf32> to vector<16xf32>
    %172 = vector.shape_cast %171 : vector<16xf32> to vector<16x1xf32>
    %173 = tpu.reciprocal %172 {approx = true} : vector<16x1xf32> -> vector<16x1xf32>
    %174 = vector.broadcast %173 : vector<16x1xf32> to vector<16x16xf32>
    %175 = arith.mulf %170, %174 : vector<16x16xf32>
    %176 = arith.truncf %175 : vector<16x16xf32> to vector<16x16xbf16>
    %cst_74 = arith.constant dense<0.000000e+00> : vector<16x8xf32>
    %177 = tpu.matmul %176, %160, %cst_74 {dimension_numbers = #tpu.dot_dimension_numbers<[1], [0], [0], [1], [0, 0, 1, 1], [], []>} : vector<16x16xbf16>, vector<16x8xbf16>, vector<16x8xf32> -> vector<16x8xf32>
    %178 = tpu.concatenate %108, %131, %154, %177 in 1 : vector<16x8xf32>, vector<16x8xf32>, vector<16x8xf32>, vector<16x8xf32> -> vector<16x32xf32>
    %179 = arith.truncf %178 : vector<16x32xf32> to vector<16x32xbf16>
    %cst_75 = arith.constant dense<0.000000e+00> : vector<16x32xf32>
    %180 = tpu.matmul %179, %72, %cst_75 {dimension_numbers = #tpu.dot_dimension_numbers<[1], [0], [0], [1], [0, 0, 1, 1], [], []>} : vector<16x32xbf16>, vector<32x32xbf16>, vector<16x32xf32> -> vector<16x32xf32>
    %181 = vector.broadcast %73 : vector<1x32xf32> to vector<16x32xf32>
    %182 = arith.addf %180, %181 : vector<16x32xf32>
    %183 = arith.addf %182, %59 : vector<16x32xf32>
    %cst_76 = arith.constant dense<0.000000e+00> : vector<16xf32>
    %184 = vector.multi_reduction <add>, %183, %cst_76 [1] : vector<16x32xf32> to vector<16xf32>
    %185 = vector.shape_cast %184 : vector<16xf32> to vector<16x1xf32>
    %cst_77 = arith.constant 3.200000e+01 : f32
    %186 = vector.broadcast %cst_77 : f32 to vector<16x1xf32>
    %187 = arith.divf %185, %186 : vector<16x1xf32>
    %188 = vector.broadcast %187 : vector<16x1xf32> to vector<16x32xf32>
    %189 = arith.subf %183, %188 : vector<16x32xf32>
    %190 = arith.mulf %189, %189 : vector<16x32xf32>
    %cst_78 = arith.constant dense<0.000000e+00> : vector<16xf32>
    %191 = vector.multi_reduction <add>, %190, %cst_78 [1] : vector<16x32xf32> to vector<16xf32>
    %192 = vector.shape_cast %191 : vector<16xf32> to vector<16x1xf32>
    %cst_79 = arith.constant 3.200000e+01 : f32
    %193 = vector.broadcast %cst_79 : f32 to vector<16x1xf32>
    %194 = arith.divf %192, %193 : vector<16x1xf32>
    %195 = vector.broadcast %187 : vector<16x1xf32> to vector<16x32xf32>
    %196 = arith.subf %183, %195 : vector<16x32xf32>
    %cst_80 = arith.constant 9.99999996E-13 : f32
    %197 = vector.broadcast %cst_80 : f32 to vector<16x1xf32>
    %198 = arith.addf %194, %197 : vector<16x1xf32>
    %199 = math.rsqrt %198 : vector<16x1xf32>
    %200 = vector.broadcast %199 : vector<16x1xf32> to vector<16x32xf32>
    %201 = arith.mulf %196, %200 : vector<16x32xf32>
    %202 = vector.broadcast %74 : vector<1x32xf32> to vector<16x32xf32>
    %203 = arith.mulf %201, %202 : vector<16x32xf32>
    %204 = vector.broadcast %75 : vector<1x32xf32> to vector<16x32xf32>
    %205 = arith.addf %203, %204 : vector<16x32xf32>
    %c0_81 = arith.constant 0 : index
    %c0_82 = arith.constant 0 : index
    %c0_83 = arith.constant 0 : index
    %206 = vector.load %arg20[%c0_81, %c0_82, %c0_83] : memref<1x16x32xf32, #tpu.memory_space<vmem>>, vector<1x16x32xf32>
    %207 = vector.shape_cast %206 : vector<1x16x32xf32> to vector<16x32xf32>
    %208 = vector.shape_cast %205 : vector<16x32xf32> to vector<1x16x32xf32>
    tpu.vector_store %arg20[%c0_81, %c0_82, %c0_83], %208 {strides = array<i32>} : memref<1x16x32xf32, #tpu.memory_space<vmem>>, vector<1x16x32xf32>,
    return
  }
  func.func @transform_0(%arg0: i32) -> (i32, i32, i32) {
    %c0_i32 = arith.constant 0 : i32
    %c0_i32_0 = arith.constant 0 : i32
    %c0_i32_1 = arith.constant 0 : i32
    return %arg0, %c0_i32, %c0_i32_0 : i32, i32, i32
  }
  func.func @transform_1(%arg0: i32) -> (i32, i32, i32) {
    %c0_i32 = arith.constant 0 : i32
    %c0_i32_0 = arith.constant 0 : i32
    %c0_i32_1 = arith.constant 0 : i32
    return %arg0, %c0_i32, %c0_i32_0 : i32, i32, i32
  }
  func.func @transform_2(%arg0: i32) -> (i32, i32) {
    %c0_i32 = arith.constant 0 : i32
    %c0_i32_0 = arith.constant 0 : i32
    %c0_i32_1 = arith.constant 0 : i32
    return %c0_i32, %c0_i32_0 : i32, i32
  }
  func.func @transform_3(%arg0: i32) -> (i32, i32) {
    %c0_i32 = arith.constant 0 : i32
    %c0_i32_0 = arith.constant 0 : i32
    %c0_i32_1 = arith.constant 0 : i32
    return %c0_i32, %c0_i32_0 : i32, i32
  }
  func.func @transform_4(%arg0: i32) -> (i32, i32) {
    %c0_i32 = arith.constant 0 : i32
    %c0_i32_0 = arith.constant 0 : i32
    %c0_i32_1 = arith.constant 0 : i32
    return %c0_i32, %c0_i32_0 : i32, i32
  }
  func.func @transform_5(%arg0: i32) -> (i32, i32) {
    %c0_i32 = arith.constant 0 : i32
    %c0_i32_0 = arith.constant 0 : i32
    %c0_i32_1 = arith.constant 0 : i32
    return %c0_i32, %c0_i32_0 : i32, i32
  }
  func.func @transform_6(%arg0: i32) -> (i32, i32) {
    %c0_i32 = arith.constant 0 : i32
    %c0_i32_0 = arith.constant 0 : i32
    %c0_i32_1 = arith.constant 0 : i32
    return %c0_i32, %c0_i32_0 : i32, i32
  }
  func.func @transform_7(%arg0: i32) -> (i32, i32) {
    %c0_i32 = arith.constant 0 : i32
    %c0_i32_0 = arith.constant 0 : i32
    %c0_i32_1 = arith.constant 0 : i32
    return %c0_i32, %c0_i32_0 : i32, i32
  }
  func.func @transform_8(%arg0: i32) -> (i32, i32) {
    %c0_i32 = arith.constant 0 : i32
    %c0_i32_0 = arith.constant 0 : i32
    %c0_i32_1 = arith.constant 0 : i32
    return %c0_i32, %c0_i32_0 : i32, i32
  }
  func.func @transform_9(%arg0: i32) -> (i32, i32) {
    %c0_i32 = arith.constant 0 : i32
    %c0_i32_0 = arith.constant 0 : i32
    %c0_i32_1 = arith.constant 0 : i32
    return %c0_i32, %c0_i32_0 : i32, i32
  }
  func.func @transform_10(%arg0: i32) -> (i32, i32) {
    %c0_i32 = arith.constant 0 : i32
    %c0_i32_0 = arith.constant 0 : i32
    %c0_i32_1 = arith.constant 0 : i32
    return %c0_i32, %c0_i32_0 : i32, i32
  }
  func.func @transform_11(%arg0: i32) -> (i32, i32) {
    %c0_i32 = arith.constant 0 : i32
    %c0_i32_0 = arith.constant 0 : i32
    %c0_i32_1 = arith.constant 0 : i32
    return %c0_i32, %c0_i32_0 : i32, i32
  }
  func.func @transform_12(%arg0: i32) -> (i32, i32) {
    %c0_i32 = arith.constant 0 : i32
    %c0_i32_0 = arith.constant 0 : i32
    %c0_i32_1 = arith.constant 0 : i32
    return %c0_i32, %c0_i32_0 : i32, i32
  }
  func.func @transform_13(%arg0: i32) -> (i32, i32) {
    %c0_i32 = arith.constant 0 : i32
    %c0_i32_0 = arith.constant 0 : i32
    %c0_i32_1 = arith.constant 0 : i32
    return %c0_i32, %c0_i32_0 : i32, i32
  }
  func.func @transform_14(%arg0: i32) -> (i32, i32) {
    %c0_i32 = arith.constant 0 : i32
    %c0_i32_0 = arith.constant 0 : i32
    %c0_i32_1 = arith.constant 0 : i32
    return %c0_i32, %c0_i32_0 : i32, i32
  }
  func.func @transform_15(%arg0: i32) -> (i32, i32) {
    %c0_i32 = arith.constant 0 : i32
    %c0_i32_0 = arith.constant 0 : i32
    %c0_i32_1 = arith.constant 0 : i32
    return %c0_i32, %c0_i32_0 : i32, i32
  }
  func.func @transform_16(%arg0: i32) -> (i32, i32) {
    %c0_i32 = arith.constant 0 : i32
    %c0_i32_0 = arith.constant 0 : i32
    %c0_i32_1 = arith.constant 0 : i32
    return %c0_i32, %c0_i32_0 : i32, i32
  }
  func.func @transform_17(%arg0: i32) -> (i32, i32) {
    %c0_i32 = arith.constant 0 : i32
    %c0_i32_0 = arith.constant 0 : i32
    %c0_i32_1 = arith.constant 0 : i32
    return %c0_i32, %c0_i32_0 : i32, i32
  }
  func.func @transform_18(%arg0: i32) -> (i32, i32) {
    %c0_i32 = arith.constant 0 : i32
    %c0_i32_0 = arith.constant 0 : i32
    %c0_i32_1 = arith.constant 0 : i32
    return %c0_i32, %c0_i32_0 : i32, i32
  }
  func.func @transform_19(%arg0: i32) -> (i32, i32, i32) {
    %c0_i32 = arith.constant 0 : i32
    %c0_i32_0 = arith.constant 0 : i32
    %c0_i32_1 = arith.constant 0 : i32
    return %arg0, %c0_i32, %c0_i32_0 : i32, i32, i32
  }
}

</mosaic_0001>

<bundles_post_ra>
// kernel: tpu_custom_call.1
= control target key start
LH: loop header
LB: loop body
LE: loop exit
PB: predicated region body
PF: predicated region fallthrough
CT: control target
= control target key end

     0   :  { %6 = vsyncpa [#allocation3], 0  ;;  %s482_s0 = inlined_call_operand.hbm [shape: f32[8,128], index: 0, kind: input, shape index: {}]   ;;  %s483_s1 = inlined_call_operand.hbm [shape: f32[16,128], index: 1, kind: output, shape index: {}]  }
   0x1   :  { %7 = vsyncpa [#allocation4], 0 }
   0x2   :  { %9 = vsyncpa [#allocation4 + $0x1], 0  ;;  %s352_s6 = smov 0   ;;  %s354_s7 = smov 0  }
   0x3   :  { %s356_s8 = smov 0   ;;  %s358_s9 = smov 0  }
   0x4 LB: > { %s373_s10 = sadd.s32 4294967295, %s338_s9   ;;  %s184_s11 = sadd.s32 4294967294, %s338_s9   ;;  %s338_s9 = sphi %s358_s9, %s499_s9   ;;  %s334_s8 = sphi %s356_s8, %s498_s8   ;;  %s330_s7 = sphi %s354_s7, %s497_s7   ;;  %s326_s6 = sphi %s352_s6, %s496_s6  }
   0x5   : > { %s377_s12 = sadd.s32 1, %s338_s9   ;;  %s43_s13 = sadd.s32 1, %s334_s8 }
   0x6   : > { %s40_s14 = ssub.s32 %s338_s9, %s377_s12  ;;  %p53_p0 = scmp.ne.s32.totalorder %s334_s8, %s330_s7 }
   0x7   : > { %p41_p1 = scmp.eq.s32.totalorder %s40_s14, 0  ;;  %p54_p2 = scmp.eq.s32.totalorder %s373_s10, 1 }
   0x8   : > { %p59_p3 = scmp.ne.s32.totalorder %s330_s7, %s326_s6  ;;  %p60_p4 = scmp.eq.s32.totalorder %s184_s11, 1 }
   0x9   : > { %s388_s15 = scalar_select %p41_p1, %s334_s8, %s43_s13  }
   0xa   : > { %p390_p5 = por %p54_p2, %p53_p0  ;;  %p394_p6 = por %p60_p4, %p59_p3 }
   0xb   : > { %p185_p7 = scmp.ge.s32.totalorder %s338_s9, 1  ;;  %p67_p8 = scmp.lt.s32.totalorder %s338_s9, 3 }
   0xc   : > { %s487_s16 = scalar_select %p390_p5, 1, 0 }
   0xd   : > { %s488_s17 = scalar_select %p394_p6, 1, 0 }
   0xe   : > { %p484_p9 = scmp.eq.s32.totalorder %s373_s10, 0  ;;  %p401_p10 = pnand %p185_p7, %p67_p8 }
   0xf   : > { %s340_s19 = smov [#allocation2]   ;;  %s244_s24 = scalar_lea.hbm %s482_s0, 128 }
  0x10   : > { %s489_s18 = scalar_select %p401_p10, 1, 0 }
  0x11   : > { %s80_s20 = sshll.u32 %s340_s19, 4  ;;  %p200_p11 = pneg %p401_p10  ;;  %s81_s20 = int_to_ptr.vmem [resolvable:$true] %s80_s20 }
  0x12   : > { %p245_p13 = scmp.ne.s32.totalorder %s482_s0, %s244_s24  ;;  %p251_p3 = scmp.lt.u32.totalorder %s244_s24, %s482_s0 }
  0x13   : > { %p409_p12 = pnand %p484_p9, %p200_p11 }
  0x15   : > { %p246_p0 = pneg %p409_p12 }
  0x17   : > { %p247_p1 = pnand %p246_p0, %p245_p13 }
  0x19   : > { %p248_p2 = pneg %p247_p1 }
  0x1b   : > { %p253_p4 = pnand %p251_p3, %p248_p2 }
  0x1d   : > { %256 = shalt.err (!%p253_p4)
}
  0x1e   : > { %s257_s29 = scalar_lea.vmem %s81_s20, 128  ;;  %p265_p9 = scmp.lt.s32.totalorder %s81_s20, %s81_s20 }
  0x1f   : > { %p258_p7 = scmp.ne.s32.totalorder %s81_s20, %s257_s29  ;;  %p266_p6 = scmp.lt.s32.totalorder %s257_s29, %s257_s29 }
  0x21   : > { %p260_p8 = pnand %p258_p7, %p246_p0  ;;  %p267_p5 = por %p266_p6, %p265_p9 }
  0x23   : > { %p261_p11 = pneg %p260_p8 }
  0x25   : > { %p268_p10 = pnand %p267_p5, %p261_p11 }
  0x27   : > { %271 = shalt.err (!%p268_p10)
}
  0x28   : > { %203 = dma.hbm_to_vmem [thread:$0]  (!%p409_p12), %s482_s0, 128, %s81_s20, [#allocation3]  }
  0x29   : > { %p491_p13 = scmp.ne.s32.totalorder %s489_s18, 0 }
  0x2a   : > { %p492_p1 = scmp.eq.s32.totalorder (!%p491_p13), %s373_s10, 0 }
  0x2b   : > { %93 = sbr.rel (%p491_p13) target bundleno = 77 (0x4d), region = 24 }
  0x32   : > { %317 = dma.done.wait (%p492_p1), [#allocation3], 128   ;;  %p493_p0 = pmov %p492_p1 }
  0x33   : > { %s105_s3 = sand.u32 1, %s330_s7   ;;  %s191_s13 = sshll.u32 %s373_s10, 7  ;;  %v108_v0 = vld [vmem:[#allocation2] sm:$0xff] }
  0x34   : > { %319 = vsyncadd (%p493_p0), [#allocation3], 4294967168  ;;  %s189_s4 = sshll.u32 %s105_s3, 3  ;;  %v109_v1 = vadd.f32 1.0, %v108_v0  ;;  %s442_s19 = scalar_lea.hbm %s483_s1, %s191_s13 }
  0x35   : > { %s107_s5 = scalar_lea.vmem [#allocation5], %s189_s4  ;;  %s112_s20 = scalar_lea.sflag [#allocation4], %s105_s3 }
  0x36   : > { %s125_s11 = sshll.u32 %s107_s5, 4  ;;  %110 = vst [vmem:[%s107_s5] sm:$0xff] %v109_v1  ;;  %p494_p6 = scmp.ne.s32.totalorder %s487_s16, 0  ;;  %s437_s11 = int_to_ptr.vmem [resolvable:$true] %s125_s11 }
  0x37   : > { %s272_s21 = scalar_lea.vmem %s437_s11, 128  ;;  %s341_s10 = smov [#allocation5]  }
  0x38   : > { %p273_p5 = scmp.ne.s32.totalorder %s437_s11, %s272_s21  ;;  %s276_s22 = sshll.u32 %s341_s10, 4  ;;  %s277_s22 = int_to_ptr.vmem [resolvable:$false] %s276_s22 }
  0x39   : > { %s278_s23 = scalar_lea.vmem %s277_s22, 256  ;;  %p279_p12 = scmp.lt.s32.totalorder %s437_s11, %s277_s22 }
  0x3a   : > { %p274_p9 = pnand %p273_p5, %p494_p6  ;;  %p280_p2 = scmp.lt.s32.totalorder %s278_s23, %s272_s21 }
  0x3c   : > { %p275_p10 = pneg %p274_p9  ;;  %p281_p3 = por %p280_p2, %p279_p12 }
  0x3e   : > { %p282_p4 = pnand %p281_p3, %p275_p10 }
  0x40   : > { %285 = shalt.err (!%p282_p4)
}
  0x41   : > { %s286_s24 = scalar_lea.hbm %s442_s19, 128  ;;  %s290_s27 = scalar_lea.hbm %s483_s1, 256 }
  0x42   : > { %p287_p7 = scmp.ne.s32.totalorder %s442_s19, %s286_s24  ;;  %p291_p13 = scmp.lt.u32.totalorder %s442_s19, %s483_s1 }
  0x43   : > { %p292_p1 = scmp.lt.u32.totalorder %s290_s27, %s286_s24  ;;  %p294_p5 = scmp.lt.u32.totalorder %s286_s24, %s442_s19 }
  0x44   : > { %p288_p8 = pnand %p287_p7, %p494_p6 }
  0x45   : > { %p293_p0 = por %p292_p1, %p291_p13 }
  0x46   : > { %p289_p11 = pneg %p288_p8 }
  0x47   : > { %p295_p9 = por %p294_p5, %p293_p0 }
  0x49   : > { %p296_p10 = pnand %p295_p9, %p289_p11 }
  0x4b   : > { %299 = shalt.err (!%p296_p10)
}
  0x4c   : > { %198 = dma.vmem_to_hbm [thread:$0]  (%p494_p6), %s437_s11, 128, %s442_s19, %s112_s20  }
  0x4d PF: > { %p210_p12 = scmp.ge.s32.totalorder %s338_s9, 2  ;;  %s137_s30 = sand.u32 1, %s326_s6  }
  0x4e   : > { %p495_p2 = scmp.ne.s32.totalorder %s488_s17, 0  ;;  %s138_s2 = scalar_lea.sflag [#allocation4], %s137_s30 }
  0x50   : > { %p205_p3 = pnand %p210_p12, %p495_p2 }
  0x52   : > { %321 = dma.done.wait (!%p205_p3), %s138_s2, 128  }
  0x53   : > { %323 = vsyncadd (!%p205_p3), %s138_s2, 4294967168  ;;  %p12_p4 = scmp.ge.s32.totalorder %s377_s12, 4   ;;  %s496_s6 = smov %s330_s7 }
  0x54   : > { %s497_s7 = smov %s334_s8  ;;  %s498_s8 = smov %s388_s15 }
  0x55   : > { %s499_s9 = smov %s377_s12  ;;  %14 = sbr.rel (!%p12_p4) target bundleno = 4 (0x4), region = 61 }
  0x5c   :  { %143 = vsyncpa [#allocation3], 1 }
  0x5d   :  { %145 = vsyncpa [#allocation3 + $0x1], 1 }
  0x5e   :  { %146 = vsyncpa [#allocation4], 1 }
  0x5f   :  { %148 = vsyncpa [#allocation4 + $0x1], 1 }

// kernel: tpu_custom_call.1
= control target key start
LH: loop header
LB: loop body
LE: loop exit
PB: predicated region body
PF: predicated region fallthrough
CT: control target
= control target key end

     0   :  { %s3339_s0 = inlined_call_operand.vmem [shape: f32[2,16,40], index: 0, kind: input, shape index: {}]   ;;  %s3340_s1 = inlined_call_operand.hbm [shape: f32[2,1,16], index: 1, kind: input, shape index: {}]   ;;  %s3341_s2 = inlined_call_operand.vmem [shape: f32[1,40], index: 2, kind: input, shape index: {}]   ;;  %s3342_s3 = inlined_call_operand.hbm [shape: f32[1,40], index: 3, kind: input, shape index: {}]   ;;  %s3343_s4 = inlined_call_operand.vmem [shape: bf16[40,32], index: 4, kind: input, shape index: {}]   ;;  %s3344_s5 = inlined_call_operand.hbm [shape: f32[1,32], index: 5, kind: input, shape index: {}]   ;;  %s3345_s6 = inlined_call_operand.vmem [shape: f32[16,32], index: 6, kind: input, shape index: {}]   ;;  %s3346_s7 = inlined_call_operand.hbm [shape: f32[1,32], index: 7, kind: input, shape index: {}]   ;;  %s3347_s8 = inlined_call_operand.hbm [shape: f32[1,32], index: 8, kind: input, shape index: {}]   ;;  %s3348_s9 = inlined_call_operand.vmem [shape: bf16[32,32], index: 9, kind: input, shape index: {}]   ;;  %s3349_s10 = inlined_call_operand.hbm [shape: f32[1,32], index: 10, kind: input, shape index: {}]   ;;  %s3350_s11 = inlined_call_operand.hbm [shape: bf16[32,32], index: 11, kind: input, shape index: {}]   ;;  %s3351_s12 = inlined_call_operand.hbm [shape: f32[1,32], index: 12, kind: input, shape index: {}]   ;;  %s3352_s13 = inlined_call_operand.vmem [shape: bf16[32,32], index: 13, kind: input, shape index: {}]   ;;  %s3353_s14 = inlined_call_operand.vmem [shape: f32[1,32], index: 14, kind: input, shape index: {}]   ;;  %s3354_s15 = inlined_call_operand.hbm [shape: bf16[32,32], index: 15, kind: input, shape index: {}]   ;;  %s3355_s16 = inlined_call_operand.vmem [shape: f32[1,32], index: 16, kind: input, shape index: {}]   ;;  %s3356_s17 = inlined_call_operand.vmem [shape: f32[1,32], index: 17, kind: input, shape index: {}]   ;;  %s3357_s18 = inlined_call_operand.vmem [shape: f32[1,32], index: 18, kind: input, shape index: {}]   ;;  %s3358_s19 = inlined_call_operand.hbm [shape: f32[2,16,32], index: 19, kind: output, shape index: {}]  }
   0x1   :  { %3369 = sst [smem:[#allocation24_spill]] %s3339_s0 }
   0x2   :  { %3370 = sst [smem:[#allocation25_spill]] %s3340_s1 }
   0x3   :  { %3371 = sst [smem:[#allocation26_spill]] %s3341_s2 }
   0x4   :  { %3372 = sst [smem:[#allocation27_spill]] %s3342_s3 }
   0x5   :  { %3373 = sst [smem:[#allocation28_spill]] %s3344_s5 }
   0x6   :  { %3374 = sst [smem:[#allocation29_spill]] %s3346_s7 }
   0x7   :  { %3375 = sst [smem:[#allocation30_spill]] %s3348_s9 }
   0x8   :  { %3376 = sst [smem:[#allocation31_spill]] %s3352_s13 }
   0x9   :  { %3377 = sst [smem:[#allocation32_spill]] %s3353_s14 }
   0xa   :  { %3378 = sst [smem:[#allocation33_spill]] %s3355_s16 }
   0xb   :  { %3379 = sst [smem:[#allocation34_spill]] %s3356_s17 }
   0xc   :  { %3380 = sst [smem:[#allocation35_spill]] %s3357_s18 }
   0xd   :  { %3381 = sst [smem:[#allocation36_spill]] %s3358_s19 }
   0xe   :  { %24 = vsyncpa [#allocation3], 0 }
   0xf   :  { %26 = vsyncpa [#allocation3 + $0x1], 0 }
  0x10   :  { %27 = vsyncpa [#allocation6], 0 }
  0x11   :  { %28 = vsyncpa [#allocation9], 0 }
  0x12   :  { %29 = vsyncpa [#allocation12], 0 }
  0x13   :  { %30 = vsyncpa [#allocation15], 0 }
  0x14   :  { %31 = vsyncpa [#allocation4], 0 }
  0x15   :  { %33 = vsyncpa [#allocation4 + $0x1], 0  ;;  %s2796_s0 = smov 0   ;;  %s2798_s30 = smov 0  }
  0x16   :  { %s2800_s20 = smov 0   ;;  %s2802_s21 = smov 0  }
  0x17 LB: > { %s2675_s1 = smov [#allocation5]   ;;  %s2817_s2 = sadd.s32 4294967295, %s2673_s21   ;;  %s2673_s21 = sphi %s2802_s21, %s3420_s21   ;;  %s2669_s20 = sphi %s2800_s20, %s3419_s20   ;;  %s2665_s30 = sphi %s2798_s30, %s3418_s30   ;;  %s2661_s0 = sphi %s2796_s0, %s3417_s0  }
  0x18   : > { %s495_s22 = sshll.u32 %s2675_s1, 4  ;;  %p1942_p0 = scmp.ge.s32.totalorder %s2673_s21, 1  ;;  %s2822_s22 = int_to_ptr.vmem [resolvable:$true] %s495_s22 }
  0x19   : > { %p3364_p1 = scmp.eq.s32.totalorder %s2817_s2, 0  ;;  %p479_p2 = scmp.lt.s32.totalorder %s2673_s21, 3 }
  0x1a   : > { %s2676_s24 = smov [#allocation8]   ;;  %s2677_s3 = smov [#allocation11]  }
  0x1b   : > { %p2824_p3 = pnand %p1942_p0, %p479_p2  ;;  %s523_s25 = sshll.u32 %s2676_s24, 4  ;;  %s2831_s25 = int_to_ptr.vmem [resolvable:$true] %s523_s25 }
  0x1c   : > { %s548_s26 = sshll.u32 %s2677_s3, 4  ;;  %s2678_s28 = smov [#allocation14]   ;;  %s2839_s26 = int_to_ptr.vmem [resolvable:$true] %s548_s26 }
  0x1d   : > { %s3382_s23 = scalar_select %p2824_p3, 1, 0 }
  0x1e   : > { %p2165_p5 = pneg %p2824_p3  ;;  %s2841_s29 = sshll.u32 %s2678_s28, 4  ;;  %s573_s29 = int_to_ptr.vmem [resolvable:$true] %s2841_s29 }
  0x1f   : > { %s3384_s18 = sld [smem:[#allocation27_spill]] }
  0x20   : > { %p2835_p6 = pnand %p2165_p5, %p3364_p1 }
  0x22   : > { %p2851_p8 = pneg %p2835_p6 }
  0x25   : > { %s2337_s17 = scalar_lea.hbm %s3384_s18, 16 }
  0x26   : > { %p2338_p7 = scmp.ne.s32.totalorder %s3384_s18, %s2337_s17  ;;  %p2344_p11 = scmp.lt.u32.totalorder %s2337_s17, %s3384_s18 }
  0x28   : > { %p2340_p9 = pnand %p2851_p8, %p2338_p7 }
  0x2a   : > { %p2341_p10 = pneg %p2340_p9 }
  0x2c   : > { %p2346_p12 = pnand %p2344_p11, %p2341_p10 }
  0x2e   : > { %2349 = shalt.err (!%p2346_p12)
}
  0x2f   : > { %s2350_s16 = scalar_lea.vmem %s2822_s22, 16  ;;  %s2357_s19 = scalar_lea.vmem %s2822_s22, 32 }
  0x30   : > { %p2351_p13 = scmp.ne.s32.totalorder %s2822_s22, %s2350_s16  ;;  %p2358_p5 = scmp.lt.s32.totalorder %s2822_s22, %s2822_s22 }
  0x31   : > { %p2359_p7 = scmp.lt.s32.totalorder %s2357_s19, %s2350_s16 }
  0x32   : > { %p2353_p0 = pnand %p2351_p13, %p2851_p8 }
  0x33   : > { %p2360_p9 = por %p2359_p7, %p2358_p5 }
  0x34   : > { %p2354_p2 = pneg %p2353_p0 }
  0x36   : > { %p2361_p4 = pnand %p2360_p9, %p2354_p2 }
  0x38   : > { %2364 = shalt.err (!%p2361_p4)
}
  0x39   : > { %2168 = dma.hbm_to_vmem [thread:$0]  (!%p2835_p6), %s3384_s18, 16, %s2822_s22, [#allocation6]  }
  0x3a   : > { %s3386_s7 = sld [smem:[#allocation29_spill]] }
  0x40   : > { %s2365_s28 = scalar_lea.hbm %s3386_s7, 16 }
  0x41   : > { %p2366_p10 = scmp.ne.s32.totalorder %s3386_s7, %s2365_s28  ;;  %p2372_p4 = scmp.lt.u32.totalorder %s2365_s28, %s3386_s7 }
  0x43   : > { %p2368_p11 = pnand %p2366_p10, %p2851_p8 }
  0x45   : > { %p2369_p12 = pneg %p2368_p11 }
  0x47   : > { %p2374_p13 = pnand %p2372_p4, %p2369_p12 }
  0x49   : > { %2377 = shalt.err (!%p2374_p13)
}
  0x4a   : > { %s2378_s22 = scalar_lea.vmem %s2831_s25, 16  ;;  %s2385_s9 = scalar_lea.vmem %s2831_s25, 32 }
  0x4b   : > { %p2379_p0 = scmp.ne.s32.totalorder %s2831_s25, %s2378_s22  ;;  %p2386_p7 = scmp.lt.s32.totalorder %s2831_s25, %s2831_s25 }
  0x4c   : > { %p2387_p9 = scmp.lt.s32.totalorder %s2385_s9, %s2378_s22 }
  0x4d   : > { %p2381_p2 = pnand %p2379_p0, %p2851_p8 }
  0x4e   : > { %p2388_p10 = por %p2387_p9, %p2386_p7 }
  0x4f   : > { %p2382_p5 = pneg %p2381_p2 }
  0x51   : > { %p2389_p11 = pnand %p2388_p10, %p2382_p5 }
  0x53   : > { %2392 = shalt.err (!%p2389_p11)
}
  0x54   : > { %2174 = dma.hbm_to_vmem [thread:$0]  (!%p2835_p6), %s3386_s7, 16, %s2831_s25, [#allocation9]  }
  0x55   : > { %s2393_s24 = scalar_lea.hbm %s3349_s10, 16 }
  0x56   : > { %p2394_p12 = scmp.ne.s32.totalorder %s3349_s10, %s2393_s24  ;;  %p2400_p0 = scmp.lt.u32.totalorder %s2393_s24, %s3349_s10 }
  0x58   : > { %p2396_p4 = pnand %p2394_p12, %p2851_p8 }
  0x5a   : > { %p2397_p13 = pneg %p2396_p4 }
  0x5c   : > { %p2402_p2 = pnand %p2400_p0, %p2397_p13 }
  0x5e   : > { %2405 = shalt.err (!%p2402_p2)
}
  0x5f   : > { %s2406_s25 = scalar_lea.vmem %s2839_s26, 16  ;;  %s2413_s9 = scalar_lea.vmem %s2839_s26, 32 }
  0x60   : > { %p2407_p5 = scmp.ne.s32.totalorder %s2839_s26, %s2406_s25  ;;  %p2414_p10 = scmp.lt.s32.totalorder %s2839_s26, %s2839_s26 }
  0x61   : > { %p2415_p11 = scmp.lt.s32.totalorder %s2413_s9, %s2406_s25 }
  0x62   : > { %p2409_p7 = pnand %p2407_p5, %p2851_p8 }
  0x63   : > { %p2416_p12 = por %p2415_p11, %p2414_p10 }
  0x64   : > { %p2410_p9 = pneg %p2409_p7 }
  0x66   : > { %p2417_p4 = pnand %p2416_p12, %p2410_p9 }
  0x68   : > { %2420 = shalt.err (!%p2417_p4)
}
  0x69   : > { %2180 = dma.hbm_to_vmem [thread:$0]  (!%p2835_p6), %s3349_s10, 16, %s2839_s26, [#allocation12]  }
  0x6a   : > { %s2679_s17 = smov [#allocation7]   ;;  %s2421_s16 = scalar_lea.hbm %s3351_s12, 16 }
  0x6b   : > { %s509_s1 = sshll.u32 %s2679_s17, 4  ;;  %p2422_p13 = scmp.ne.s32.totalorder %s3351_s12, %s2421_s16  ;;  %s510_s1 = int_to_ptr.vmem [resolvable:$true] %s509_s1 }
  0x6c   : > { %p2428_p5 = scmp.lt.u32.totalorder %s2421_s16, %s3351_s12 }
  0x6d   : > { %p2424_p0 = pnand %p2422_p13, %p2851_p8 }
  0x6f   : > { %p2425_p2 = pneg %p2424_p0 }
  0x71   : > { %p2430_p7 = pnand %p2428_p5, %p2425_p2 }
  0x73   : > { %2433 = shalt.err (!%p2430_p7)
}
  0x74   : > { %s2434_s26 = scalar_lea.vmem %s573_s29, 16  ;;  %s2441_s13 = scalar_lea.vmem %s573_s29, 32 }
  0x75   : > { %p2435_p9 = scmp.ne.s32.totalorder %s573_s29, %s2434_s26  ;;  %p2442_p12 = scmp.lt.s32.totalorder %s573_s29, %s573_s29 }
  0x76   : > { %p2443_p4 = scmp.lt.s32.totalorder %s2441_s13, %s2434_s26 }
  0x77   : > { %p2437_p10 = pnand %p2435_p9, %p2851_p8 }
  0x78   : > { %p2444_p1 = por %p2443_p4, %p2442_p12 }
  0x79   : > { %p2438_p11 = pneg %p2437_p10 }
  0x7b   : > { %p2445_p3 = pnand %p2444_p1, %p2438_p11 }
  0x7d   : > { %2448 = shalt.err (!%p2445_p3)
}
  0x7e   : > { %2186 = dma.hbm_to_vmem [thread:$0]  (!%p2835_p6), %s3351_s12, 16, %s573_s29, [#allocation15]  }
  0x7f   : > { %s3387_s5 = sld [smem:[#allocation28_spill]] }
  0x85   : > { %s2449_s16 = scalar_lea.hbm %s3387_s5, 16 }
  0x86   : > { %p2450_p13 = scmp.ne.s32.totalorder %s3387_s5, %s2449_s16  ;;  %p2456_p3 = scmp.lt.u32.totalorder %s2449_s16, %s3387_s5 }
  0x88   : > { %p2452_p0 = pnand %p2450_p13, %p2851_p8 }
  0x8a   : > { %p2453_p1 = pneg %p2452_p0 }
  0x8c   : > { %p2458_p2 = pnand %p2456_p3, %p2453_p1 }
  0x8e   : > { %2461 = shalt.err (!%p2458_p2)
}
  0x8f   : > { %s2462_s26 = scalar_lea.vmem %s510_s1, 16  ;;  %s2469_s29 = scalar_lea.vmem %s510_s1, 32 }
  0x90   : > { %p2463_p5 = scmp.ne.s32.totalorder %s510_s1, %s2462_s26  ;;  %p2470_p10 = scmp.lt.s32.totalorder %s510_s1, %s510_s1 }
  0x91   : > { %p2471_p11 = scmp.lt.s32.totalorder %s2469_s29, %s2462_s26 }
  0x92   : > { %p2465_p7 = pnand %p2463_p5, %p2851_p8 }
  0x93   : > { %p2472_p12 = por %p2471_p11, %p2470_p10 }
  0x94   : > { %p2466_p9 = pneg %p2465_p7 }
  0x96   : > { %p2473_p4 = pnand %p2472_p12, %p2466_p9 }
  0x98   : > { %2476 = shalt.err (!%p2473_p4)
}
  0x99   : > { %2171 = dma.hbm_to_vmem [thread:$0]  (!%p2835_p6), %s3387_s5, 16, %s510_s1, [#allocation6]  }
  0x9a   : > { %s2680_s17 = smov [#allocation10]   ;;  %s2681_s28 = smov [#allocation13]  }
  0x9b   : > { %s534_s24 = sshll.u32 %s2680_s17, 4  ;;  %s558_s16 = sshll.u32 %s2681_s28, 4  ;;  %s535_s24 = int_to_ptr.vmem [resolvable:$true] %s534_s24  ;;  %s559_s16 = int_to_ptr.vmem [resolvable:$true] %s558_s16 }
  0x9c   : > { %s2477_s25 = scalar_lea.hbm %s3347_s8, 16 }
  0x9d   : > { %p2478_p13 = scmp.ne.s32.totalorder %s3347_s8, %s2477_s25  ;;  %p2484_p3 = scmp.lt.u32.totalorder %s2477_s25, %s3347_s8 }
  0x9f   : > { %p2480_p0 = pnand %p2478_p13, %p2851_p8 }
  0xa1   : > { %p2481_p1 = pneg %p2480_p0 }
  0xa3   : > { %p2486_p2 = pnand %p2484_p3, %p2481_p1 }
  0xa5   : > { %2489 = shalt.err (!%p2486_p2)
}
  0xa6   : > { %s2490_s1 = scalar_lea.vmem %s535_s24, 16  ;;  %s2497_s14 = scalar_lea.vmem %s535_s24, 32 }
  0xa7   : > { %p2491_p5 = scmp.ne.s32.totalorder %s535_s24, %s2490_s1  ;;  %p2498_p10 = scmp.lt.s32.totalorder %s535_s24, %s535_s24 }
  0xa8   : > { %p2499_p11 = scmp.lt.s32.totalorder %s2497_s14, %s2490_s1 }
  0xa9   : > { %p2493_p7 = pnand %p2491_p5, %p2851_p8 }
  0xaa   : > { %p2500_p12 = por %p2499_p11, %p2498_p10 }
  0xab   : > { %p2494_p9 = pneg %p2493_p7 }
  0xad   : > { %p2501_p4 = pnand %p2500_p12, %p2494_p9 }
  0xaf   : > { %2504 = shalt.err (!%p2501_p4)
}
  0xb0   : > { %2177 = dma.hbm_to_vmem [thread:$0]  (!%p2835_p6), %s3347_s8, 16, %s535_s24, [#allocation9]  }
  0xb1   : > { %s2505_s25 = scalar_lea.hbm %s3350_s11, 256 }
  0xb2   : > { %p2506_p13 = scmp.ne.s32.totalorder %s3350_s11, %s2505_s25  ;;  %p2512_p3 = scmp.lt.u32.totalorder %s2505_s25, %s3350_s11 }
  0xb4   : > { %p2508_p0 = pnand %p2506_p13, %p2851_p8 }
  0xb6   : > { %p2509_p1 = pneg %p2508_p0 }
  0xb8   : > { %p2514_p2 = pnand %p2512_p3, %p2509_p1 }
  0xba   : > { %2517 = shalt.err (!%p2514_p2)
}
  0xbb   : > { %s2518_s1 = scalar_lea.vmem %s559_s16, 256  ;;  %p2526_p10 = scmp.lt.s32.totalorder %s559_s16, %s559_s16 }
  0xbc   : > { %p2519_p5 = scmp.ne.s32.totalorder %s559_s16, %s2518_s1  ;;  %p2527_p11 = scmp.lt.s32.totalorder %s2518_s1, %s2518_s1 }
  0xbe   : > { %p2521_p7 = pnand %p2519_p5, %p2851_p8  ;;  %p2528_p12 = por %p2527_p11, %p2526_p10 }
  0xc0   : > { %p2522_p9 = pneg %p2521_p7 }
  0xc2   : > { %p2529_p4 = pnand %p2528_p12, %p2522_p9 }
  0xc4   : > { %2532 = shalt.err (!%p2529_p4)
}
  0xc5   : > { %s2682_s24 = smov 64   ;;  %s2683_s14 = smov 4  }
  0xc6   : > { %2183 = dma.hbm_to_vmem [thread:$0]  (!%p2835_p6), %s3350_s11, 256, %s559_s16, [#allocation12], %s2682_s24, %s2682_s24, %s2683_s14  }
  0xc7   : > { %s2684_s19 = smov [#allocation16]   ;;  %s2533_s26 = scalar_lea.hbm %s3354_s15, 256 }
  0xc8   : > { %s588_s22 = sshll.u32 %s2684_s19, 4  ;;  %p2534_p13 = scmp.ne.s32.totalorder %s3354_s15, %s2533_s26  ;;  %s589_s22 = int_to_ptr.vmem [resolvable:$true] %s588_s22 }
  0xc9   : > { %p2540_p3 = scmp.lt.u32.totalorder %s2533_s26, %s3354_s15 }
  0xca   : > { %p2536_p0 = pnand %p2534_p13, %p2851_p8 }
  0xcc   : > { %p2537_p1 = pneg %p2536_p0 }
  0xce   : > { %p2542_p2 = pnand %p2540_p3, %p2537_p1 }
  0xd0   : > { %2545 = shalt.err (!%p2542_p2)
}
  0xd1   : > { %s2546_s16 = scalar_lea.vmem %s589_s22, 256  ;;  %p2554_p10 = scmp.lt.s32.totalorder %s589_s22, %s589_s22 }
  0xd2   : > { %p2547_p5 = scmp.ne.s32.totalorder %s589_s22, %s2546_s16  ;;  %p2555_p11 = scmp.lt.s32.totalorder %s2546_s16, %s2546_s16 }
  0xd4   : > { %p2549_p7 = pnand %p2547_p5, %p2851_p8  ;;  %p2556_p12 = por %p2555_p11, %p2554_p10 }
  0xd6   : > { %p2550_p9 = pneg %p2549_p7 }
  0xd8   : > { %p2557_p4 = pnand %p2556_p12, %p2550_p9 }
  0xda   : > { %2560 = shalt.err (!%p2557_p4)
}
  0xdb   : > { %2189 = dma.hbm_to_vmem [thread:$0]  (!%p2835_p6), %s3354_s15, 256, %s589_s22, [#allocation15], %s2682_s24, %s2682_s24, %s2683_s14  }
  0xdc   : > { %s1941_s5 = sadd.s32 4294967294, %s2673_s21   ;;  %s3014_s27 = sadd.s32 1, %s2673_s21  }
  0xdd   : > { %s69_s3 = ssub.s32 %s2673_s21, %s3014_s27  ;;  %s72_s19 = sadd.s32 1, %s2669_s20 }
  0xde   : > { %p70_p8 = scmp.eq.s32.totalorder %s69_s3, 0  ;;  %p79_p13 = scmp.ne.s32.totalorder %s2669_s20, %s2665_s30 }
  0xdf   : > { %p80_p0 = scmp.eq.s32.totalorder %s2673_s21, 0  ;;  %p85_p1 = scmp.ne.s32.totalorder %s2665_s30, %s2661_s0 }
  0xe0   : > { %s3025_s25 = scalar_select %p70_p8, %s2669_s20, %s72_s19  }
  0xe1   : > { %p3027_p3 = por %p80_p0, %p79_p13  ;;  %p3389_p2 = scmp.eq.s32.totalorder %s2817_s2, 0 }
  0xe2   : > { %p466_p5 = scmp.eq.s32.totalorder %s2817_s2, 1  ;;  %p472_p7 = scmp.eq.s32.totalorder %s1941_s5, 1 }
  0xe3   : > { %p3033_p6 = por %p3389_p2, %p85_p1  ;;  %p2206_p9 = scmp.lt.s32.totalorder %s2673_s21, 2 }
  0xe4   : > { %s619_s14 = sand.u32 1, %s2669_s20   ;;  %p3040_p10 = por %p466_p5, %p79_p13 }
  0xe5   : > { %p3044_p11 = por %p472_p7, %p85_p1  ;;  %s1952_s29 = sshll.u32 %s2673_s21, 4 }
  0xe6   : > { %s3391_s22 = scalar_select %p3040_p10, 1, 0 }
  0xe7   : > { %s3392_s26 = scalar_select %p3044_p11, 1, 0 }
  0xe8   : > { %s622_s13 = scalar_lea.vmem [#allocation2], %s619_s14  ;;  %s3393_s28 = sld [smem:[#allocation25_spill]] }
  0xe9   : > { %s629_s1 = sshll.u32 %s622_s13, 4  ;;  %p3058_p12 = pnand %p2206_p9, %p3027_p3  ;;  %s3054_s1 = int_to_ptr.vmem [resolvable:$true] %s629_s1 }
  0xea   : > { %s620_s19 = scalar_lea.sflag [#allocation3], %s619_s14 }
  0xeb   : > { %p2563_p8 = pneg %p3058_p12 }
  0xee   : > { %s3052_s3 = scalar_lea.hbm %s3393_s28, %s1952_s29  ;;  %s2566_s17 = scalar_lea.hbm %s3393_s28, 32 }
  0xef   : > { %s2561_s13 = scalar_lea.hbm %s3052_s3, 16  ;;  %p2567_p1 = scmp.lt.u32.totalorder %s3052_s3, %s3393_s28 }
  0xf0   : > { %p2562_p4 = scmp.ne.s32.totalorder %s3052_s3, %s2561_s13  ;;  %p2568_p3 = scmp.lt.u32.totalorder %s2566_s17, %s2561_s13 }
  0xf1   : > { %p2570_p5 = scmp.lt.u32.totalorder %s2561_s13, %s3052_s3 }
  0xf2   : > { %p2564_p13 = pnand %p2563_p8, %p2562_p4  ;;  %p2569_p2 = por %p2568_p3, %p2567_p1 }
  0xf4   : > { %p2565_p0 = pneg %p2564_p13  ;;  %p2571_p7 = por %p2570_p5, %p2569_p2 }
  0xf6   : > { %p2572_p9 = pnand %p2571_p7, %p2565_p0 }
  0xf8   : > { %2575 = shalt.err (!%p2572_p9)
}
  0xf9   : > { %s2576_s14 = scalar_lea.vmem %s3054_s1, 16  ;;  %s2685_s29 = smov [#allocation2]  }
  0xfa   : > { %p2577_p4 = scmp.ne.s32.totalorder %s3054_s1, %s2576_s14  ;;  %s2581_s16 = sshll.u32 %s2685_s29, 4  ;;  %s2582_s16 = int_to_ptr.vmem [resolvable:$false] %s2581_s16 }
  0xfb   : > { %s2583_s7 = scalar_lea.vmem %s2582_s16, 32  ;;  %p2584_p10 = scmp.lt.s32.totalorder %s3054_s1, %s2582_s16 }
  0xfc   : > { %p2579_p13 = pnand %p2577_p4, %p2563_p8  ;;  %p2585_p1 = scmp.lt.s32.totalorder %s2583_s7, %s2576_s14 }
  0xfe   : > { %p2580_p11 = pneg %p2579_p13  ;;  %p2586_p3 = por %p2585_p1, %p2584_p10 }
 0x100   : > { %p2587_p2 = pnand %p2586_p3, %p2580_p11 }
 0x102   : > { %2590 = shalt.err (!%p2587_p2)
}
 0x103   : > { %2193 = dma.hbm_to_vmem [thread:$0]  (!%p3058_p12), %s3052_s3, 16, %s3054_s1, %s620_s19  }
 0x104   : > { %p3395_p0 = scmp.ne.s32.totalorder %s3382_s23, 0 }
 0x105   : > { %s3090_s13 = sand.u32 (!%p3395_p0), 1, %s2665_s30  }
 0x106   : > { %638 = sbr.rel (%p3395_p0) target bundleno = 2973 (0xb9d), region = 96  ;;  %s641_s17 = scalar_lea.sflag (!%p3395_p0), [#allocation3], %s3090_s13 }
 0x107   : > { %s643_s9 = scalar_lea.vmem (!%p3395_p0), [#allocation2], %s3090_s13 }
 0x10d   : > { %2636 = dma.done.wait (%p3033_p6), %s641_s17, 16  }
 0x10e   : > { %2638 = vsyncadd (%p3033_p6), %s641_s17, 4294967280  ;;  %p3396_p10 = scmp.eq.s32.totalorder %s2817_s2, 0 }
 0x110   : > { %2640 = dma.done.wait (%p3396_p10), [#allocation6], 32   ;;  %p3397_p11 = pmov %p3396_p10 }
 0x111   : > { %p3398_p12 = pmov %p3396_p10 }
 0x112   : > { %2642 = vsyncadd (%p3397_p11), [#allocation6], 4294967264 }
 0x113   : > { %2644 = dma.done.wait (%p3398_p12), [#allocation9], 32   ;;  %p3399_p8 = pmov %p3396_p10 }
 0x115   : > { %2646 = vsyncadd (%p3399_p8), [#allocation9], 4294967264  ;;  %p3400_p5 = pmov %p3399_p8 }
 0x117   : > { %2648 = dma.done.wait (%p3400_p5), [#allocation12], 272   ;;  %p3401_p7 = pmov %p3400_p5 }
 0x118   : > { %p3402_p6 = pmov %p3400_p5 }
 0x119   : > { %2650 = vsyncadd (%p3401_p7), [#allocation12], 4294967024 }
 0x11a   : > { %2652 = dma.done.wait (%p3402_p6), [#allocation15], 272   ;;  %p3403_p9 = pmov %p3400_p5 }
 0x11b   : > { %p734_p4 = scmp.lt.s32.totalorder %s2817_s2, 1  ;;  %s3404_s5 = sld [smem:[#allocation24_spill]]  ;;  %vm744_vm0 = vcmask 326656   ;;  %v2282_v14 = vld [vmem:[%s3343_s4] sm:$0xff]   ;;  %v2686_v15 = vmov 0.0   ;;  %v2283_v16 = vld [vmem:[%s3343_s4 + $0x8] sm:$0xff]  }
 0x11c   : > { %2654 = vsyncadd (%p3403_p9), [#allocation15], 4294967024  ;;  %2039 = vmatprep.subr.bf16.mxu0 %v2686_v15  ;;  %2049 = vmatprep.subr.bf16.mxu1 %v2686_v15  ;;  %v2284_v17 = vld [vmem:[%s3343_s4 + $0x10] ss:$0 sps:$4 sm:$0xff]   ;;  %vm819_vm1 = vcmask 1043456   ;;  %vm2687_vm2 = vmmov 0  }
 0x11d   : > { %s735_s23 = scalar_select %p734_p4, %s2817_s2, 1  ;;  %2040 = vmatpush3.bf16.msra.mxu0 %v2282_v14  ;;  %2045 = vmatprep.mubr.msk.bf16.mxu0 %vm2687_vm2, %v2686_v15  ;;  %v821_v18 = vsel %vm819_vm1, %v2284_v17, 0  ;;  %v1966_v31 = vld [vmem:[#allocation5] ss:$0 sm:$0xff]  ;;  %v1967_v36 = vld [vmem:[#allocation7] ss:$0 sm:$0xff] }
 0x11e   : > { %2041 = vmatprep.subr.bf16.mxu0 %v2686_v15  ;;  %2053 = vmatprep.mubr.msk.bf16.mxu1 %vm2687_vm2, %v2686_v15  ;;  %s3405_s3 = sld [smem:[#allocation26_spill]]  ;;  %v866_v41 = vld [vmem:[%s3345_s6] sm:$0xff]  ;;  %vm872_vm3 = vcmask 261120   ;;  %v867_v45 = vld [vmem:[%s3345_s6 + $0x8] sm:$0xff]  ;;  %s3406_s17 = sld [smem:[#allocation30_spill]]  ;;  %vm1125_vm4 = vcmask 64512  }
 0x11f   : > { %s2005_s24 = sshll.u32 %s735_s23, 4  ;;  %s3407_s1 = sld [smem:[#allocation31_spill]]  ;;  %vm1183_vm5 = vcmask 130048   ;;  %vm1657_vm6 = vcmask 195584  }
 0x120   : > { %s3408_s7 = sld [smem:[#allocation32_spill]]  ;;  %s2688_s23 = smov 120  }
 0x121   : > { %s738_s19 = scalar_lea.vmem %s3404_s5, %s2005_s24  ;;  %2042 = vmatpush3.bf16.msra.mxu0 %v2283_v16  ;;  %s2689_s24 = smov 112  }
 0x122   : > { %v740_v0 = vld [vmem:[%s738_s19] sm:$0xff]  ;;  %v741_v1 = vld [vmem:[%s738_s19 + $0x8] sm:$0xff]  ;;  %2043 = vmatprep.subr.bf16.mxu0 %v2686_v15  ;;  %s2692_s5 = smov 16   ;;  %s2693_s19 = smov 24  }
 0x123   : > { %v745_v2 = vsel %vm744_vm0, %v740_v0, 0.0  ;;  %v748_v3 = vsel %vm744_vm0, %v741_v1, 0.0  ;;  %s3409_s16 = sld [smem:[#allocation33_spill]]  ;;  %s3411_s14 = sld [smem:[#allocation35_spill]] }
 0x124   : > { %746 = vadd.xlane.f32.xlu0 %v745_v2  ;;  %v1965_v27 = vld [vmem:[%s3405_s3] ss:$0 sm:$0xff]  ;;  %v2287_v63 = vld [vmem:[%s3406_s17 + $0x8] sm:$0xff]   ;;  %s2690_s3 = smov 104   ;;  %s2006_s29 = sshll.u32 %s2817_s2, 8 }
 0x125   : > { %2044 = vmatpush3.bf16.msra.mxu0 %v821_v18  ;;  %v2285_v61 = vld [vmem:[%s3406_s17] sm:$0xff]   ;;  %v2289_v18 = vld [vmem:[#allocation13] sm:$0xff]   ;;  %p3413_p1 = scmp.ne.s32.totalorder %s3391_s22, 0 }
 0x126   : > { %2065 = vmatprep.subr.bf16.mxu0 %v2686_v15  ;;  %v2286_v62 = vld [vmem:[%s3407_s1] sm:$0xff]   ;;  %2050 = vmatpush3.bf16.msra.mxu1 %v2285_v61 }
 0x127   : > { %2051 = vmatprep.subr.bf16.mxu1 %v2686_v15 }
 0x128   : > { %749 = vadd.xlane.f32.xlu0 %v748_v3 }
 0x12a   : > { %2052 = vmatpush3.bf16.msra.mxu1 %v2287_v63 }
 0x12b   : > { %2057 = vmatprep.subr.bf16.mxu1 %v2686_v15 }
 0x1b1   : > { %v747_v4 = vpop.xlane.xlu0 %746 }
 0x1b2   : > { %v752_v5 = vmul.f32 0.025, %v747_v4 }
 0x1b4   : > { %v754_v6 = vsub.f32 %v740_v0, %v752_v5  ;;  %v2288_v0 = vld [vmem:[%s3407_s1 + $0x8] sm:$0xff]  }
 0x1b5   : > { %v750_v7 = vpop.xlane.xlu0 %749 }
 0x1b6   : > { %v753_v8 = vmul.f32 0.025, %v750_v7  ;;  %v756_v9 = vmul.f32 %v754_v6, %v754_v6 }
 0x1b8   : > { %v755_v10 = vsub.f32 %v741_v1, %v753_v8  ;;  %v758_v11 = vsel %vm744_vm0, %v756_v9, 0.0  ;;  %v1972_v8 = vld [vmem:[#allocation8] ss:$0 sm:$0xff] }
 0x1b9   : > { %759 = vadd.xlane.f32.xlu1 %v758_v11 }
 0x1ba   : > { %v757_v12 = vmul.f32 %v755_v10, %v755_v10 }
 0x1bc   : > { %v761_v13 = vsel %vm744_vm0, %v757_v12, 0.0 }
 0x1bd   : > { %762 = vadd.xlane.f32.xlu1 %v761_v13  ;;  %v1973_v13 = vld [vmem:[#allocation10] ss:$0 sm:$0xff] }
 0x246   : > { %v760_v19 = vpop.xlane.xlu1 %759 }
 0x247   : > { %v764_v20 = vmul.f32 0.025, %v760_v19 }
 0x249   : > { %v766_v21 = vadd.f32 1e-05, %v764_v20  ;;  %v2290_v20 = vld [vmem:[#allocation13 + $0x8] sm:$0xff]  }
 0x24a   : > { %v763_v22 = vpop.xlane.xlu1 %762 }
 0x24b   : > { %2293 = vrsqrt.f32 %v766_v21  ;;  %v765_v23 = vmul.f32 0.025, %v763_v22  ;;  %v1974_v21 = vld [vmem:[#allocation11] ss:$0 sm:$0xff] }
 0x24d   : > { %v767_v24 = vadd.f32 1e-05, %v765_v23  ;;  %v1982_v23 = vld [vmem:[%s3408_s7] ss:$0 sm:$0xff] }
 0x24f   : > { %2295 = vrsqrt.f32 %v767_v24 }
 0x255   : > { %v2294_v25 = vpop.eup %2293 }
 0x256   : > { %v770_v26 = vmul.f32 %v2294_v25, %v754_v6 }
 0x258   : > { %v778_v30 = vmul.f32 %v1965_v27, %v770_v26 }
 0x259   : > { %v2296_v28 = vpop.eup %2295 }
 0x25a   : > { %v771_v29 = vmul.f32 %v2296_v28, %v755_v10  ;;  %v786_v33 = vadd.f32 %v1966_v31, %v778_v30 }
 0x25c   : > { %v779_v32 = vmul.f32 %v1965_v27, %v771_v29 }
 0x25e   : > { %v787_v34 = vadd.f32 %v1966_v31, %v779_v32 }
 0x260   : > { %v788_v35 = vpack.c.bf16 %v787_v34, %v786_v33 }
 0x262   : > { %2046 = vmatmul.mubr.msk.bf16.vlgmr.msra.gmra.mrb[0].mxu0 %vm744_vm0, %v788_v35 }
 0x263   : > { %2069 = vmatprep.mubr.msk.bf16.mxu0 %vm2687_vm2, %v2686_v15  ;;  %2066 = vmatpush3.bf16.msra.mxu0 %v2286_v62 }
 0x264   : > { %2067 = vmatprep.subr.bf16.mxu0 %v2686_v15 }
 0x267   : > { %2068 = vmatpush3.bf16.msra.mxu0 %v2288_v0 }
 0x268   : > { %2079 = vmatprep.subr.bf16.mxu0 %v2686_v15 }
 0x335   : > { %v857_v37 = vpop.f32.mrb[0].mxu0 }
 0x336   : > { %v858_v38 = vadd.f32 %v1967_v36, %v857_v37  ;;  %v2047_v39 = vpop.f32.mrb[1].mxu0  ;;  %v1978_v37 = vld [vmem:[#allocation14] ss:$0 sm:$0xff] }
 0x337   : > { %v860_v40 = vpop.f32.mrb[2].mxu0 }
 0x338   : > { %v864_v42 = vmax.f32 %v858_v38, 0.0  ;;  %v861_v43 = vadd.f32 %v1967_v36, %v860_v40  ;;  %v2048_v44 = vpop.f32.mrb[3].mxu0 }
 0x33a   : > { %v865_v46 = vmax.f32 %v861_v43, 0.0  ;;  %v868_v47 = vadd.f32 %v866_v41, %v864_v42 }
 0x33c   : > { %v873_v48 = vsel %vm872_vm3, %v868_v47, 0.0  ;;  %v869_v49 = vadd.f32 %v867_v45, %v865_v46 }
 0x33d   : > { %874 = vadd.xlane.f32.xlu0 %v873_v48 }
 0x33e   : > { %v876_v50 = vsel %vm872_vm3, %v869_v49, 0.0 }
 0x33f   : > { %877 = vadd.xlane.f32.xlu1 %v876_v50 }
 0x3ca   : > { %v875_v51 = vpop.xlane.xlu0 %874 }
 0x3cb   : > { %v880_v52 = vmul.f32 0.03125, %v875_v51 }
 0x3cc   : > { %v878_v53 = vpop.xlane.xlu1 %877 }
 0x3cd   : > { %v882_v54 = vsub.f32 %v868_v47, %v880_v52  ;;  %v881_v55 = vmul.f32 0.03125, %v878_v53 }
 0x3cf   : > { %v883_v56 = vsub.f32 %v869_v49, %v881_v55  ;;  %v884_v57 = vmul.f32 %v882_v54, %v882_v54  ;;  %v1176_v55 = vlaneseq }
 0x3d1   : > { %v886_v58 = vsel %vm872_vm3, %v884_v57, 0.0  ;;  %v885_v59 = vmul.f32 %v883_v56, %v883_v56 }
 0x3d2   : > { %887 = vadd.xlane.f32.xlu0 %v886_v58  ;;  %v1177_v58 = vshrl.u32 %v1176_v55, 7 }
 0x3d3   : > { %v889_v60 = vsel %vm872_vm3, %v885_v59, 0.0 }
 0x3d4   : > { %890 = vadd.xlane.f32.xlu1 %v889_v60  ;;  %v1178_v60 = vsub.s32 0, %v1177_v58 }
 0x45f   : > { %v888_v1 = vpop.xlane.xlu0 %887 }
 0x460   : > { %v892_v2 = vmul.f32 0.03125, %v888_v1 }
 0x461   : > { %v891_v3 = vpop.xlane.xlu1 %890 }
 0x462   : > { %v894_v4 = vadd.f32 1e-05, %v892_v2  ;;  %v893_v5 = vmul.f32 0.03125, %v891_v3 }
 0x464   : > { %2297 = vrsqrt.f32 %v894_v4  ;;  %v895_v6 = vadd.f32 1e-05, %v893_v5 }
 0x466   : > { %2299 = vrsqrt.f32 %v895_v6 }
 0x46e   : > { %v2298_v7 = vpop.eup %2297 }
 0x46f   : > { %v898_v9 = vmul.f32 %v2298_v7, %v882_v54 }
 0x470   : > { %v2300_v10 = vpop.eup %2299 }
 0x471   : > { %v899_v11 = vmul.f32 %v2300_v10, %v883_v56  ;;  %v906_v12 = vmul.f32 %v1972_v8, %v898_v9  ;;  %v916_v56 = vld [vmem:[%s643_s9] sm:$0x1]  ;;  %s3367_s9 = smov 8  }
 0x472   : > { %v917_v57 = vsub.f32 1.0, %v916_v56 }
 0x473   : > { %v907_v14 = vmul.f32 %v1972_v8, %v899_v11  ;;  %v3173_v16 = vadd.f32 %v1973_v13, %v906_v12 }
 0x474   : > { %v918_v59 = vmul.f32 -10000.0, %v917_v57 }
 0x475   : > { %v3175_v17 = vadd.f32 %v1973_v13, %v907_v14 }
 0x476   : > { %v1179_v61 = vrot.slane %v918_v59, %v1178_v60 }
 0x477   : > { %v941_v19 = vpack.c.bf16 %v3175_v17, %v3173_v16 }
 0x479   : > { %2054 = vmatmul.mubr.msk.bf16.vlgmr.msra.gmra.mrb[0].mxu1 %vm872_vm3, %v941_v19  ;;  %2070 = vmatmul.mubr.msk.bf16.vlgmr.msra.gmra.mrb[4].mxu0 %vm872_vm3, %v941_v19 }
 0x47a   : > { %2058 = vmatpush3.bf16.msra.mxu1 %v2289_v18  ;;  %2061 = vmatprep.mubr.msk.bf16.mxu1 %vm2687_vm2, %v2686_v15 }
 0x47b   : > { %2059 = vmatprep.subr.bf16.mxu1 %v2686_v15  ;;  %2081 = vmatprep.mubr.msk.bf16.mxu0 %vm2687_vm2, %v2686_v15 }
 0x47e   : > { %2060 = vmatpush3.bf16.msra.mxu1 %v2290_v20 }
 0x47f   : > { %2073 = vmatprep.subr.bf16.mxu1 %v2686_v15 }
 0x481   : > { %2062 = vmatmul.mubr.msk.bf16.vlgmr.msra.gmra.mrb[4].mxu1 %vm872_vm3, %v941_v19 }
 0x482   : > { %2075 = vmatprep.mubr.msk.bf16.mxu1 %vm2687_vm2, %v2686_v15 }
 0x54c   : > { %v997_v22 = vpop.f32.mrb[0].mxu1  ;;  %v1115_v24 = vpop.f32.mrb[4].mxu0 }
 0x54d   : > { %v2055_v25 = vpop.f32.mrb[1].mxu1  ;;  %v2071_v26 = vpop.f32.mrb[5].mxu0  ;;  %v998_v29 = vadd.f32 %v1974_v21, %v997_v22  ;;  %v1116_v30 = vadd.f32 %v1982_v23, %v1115_v24 }
 0x54e   : > { %v1000_v27 = vpop.f32.mrb[2].mxu1  ;;  %v1118_v28 = vpop.f32.mrb[6].mxu0 }
 0x54f   : > { %v1001_v31 = vadd.f32 %v1974_v21, %v1000_v27  ;;  %v1119_v32 = vadd.f32 %v1982_v23, %v1118_v28  ;;  %v2056_v33 = vpop.f32.mrb[3].mxu1  ;;  %v2072_v34 = vpop.f32.mrb[7].mxu0 }
 0x551   : > { %v1122_v35 = vpack.c.bf16 %v1001_v31, %v998_v29  ;;  %v3193_v36 = vpack.c.bf16 %v1119_v32, %v1116_v30 }
 0x553   : > { %1252 = vrot.lane.b32.xlu1 %v1122_v35, %s2688_s23  ;;  %2080 = vmatpush3.bf16.msra.mxu0 %v3193_v36 }
 0x554   : > { %v1056_v38 = vpop.f32.mrb[4].mxu1  ;;  %2091 = vmatprep.subr.bf16.mxu0 %v2686_v15 }
 0x555   : > { %v2063_v39 = vpop.f32.mrb[5].mxu1  ;;  %v1057_v41 = vadd.f32 %v1978_v37, %v1056_v38 }
 0x556   : > { %v1059_v40 = vpop.f32.mrb[6].mxu1 }
 0x557   : > { %v1060_v42 = vadd.f32 %v1978_v37, %v1059_v40  ;;  %v2064_v43 = vpop.f32.mrb[7].mxu1 }
 0x559   : > { %v1123_v44 = vpack.c.bf16 %v1060_v42, %v1057_v41 }
 0x55b   : > { %1381 = vrot.lane.b32.xlu1 %v1123_v44, %s2689_s24  ;;  %1255 = vrot.lane.b32.xlu0 %v1123_v44, %s2688_s23  ;;  %v1130_v45 = vsel %vm1125_vm4, %v1123_v44, 0 }
 0x55c   : > { %2074 = vmatpush3.bf16.xpose.msra.mxu1 %v1130_v45 }
 0x55d   : > { %2085 = vmatprep.subr.bf16.mxu1 %v2686_v15 }
 0x55f   : > { %1379 = vrot.lane.b32.xlu1 %v1122_v35, %s2689_s24  ;;  %1506 = vrot.lane.b32.xlu0 %v1123_v44, %s2690_s3 }
 0x563   : > { %1504 = vrot.lane.b32.xlu1 %v1122_v35, %s2690_s3  ;;  %2076 = vmatmul.mubr.msk.bf16.vlgmr.msra.gmra.mrb[8].mxu1 %vm1125_vm4, %v1122_v35 }
 0x564   : > { %2087 = vmatprep.mubr.msk.bf16.mxu1 %vm2687_vm2, %v2686_v15 }
 0x5c5   : > { %v1253_v48 = vpop.permute.xlu1 %1252 }
 0x5cd   : > { %v1256_v46 = vpop.permute.xlu0 %1255  ;;  %v1382_v49 = vpop.permute.xlu1 %1381 }
 0x5ce   : > { %v1261_v47 = vsel %vm1125_vm4, %v1256_v46, 0  ;;  %v1387_v50 = vsel %vm1125_vm4, %v1382_v49, 0 }
 0x5cf   : > { %2086 = vmatpush3.bf16.xpose.msra.mxu1 %v1261_v47 }
 0x5d0   : > { %2097 = vmatprep.subr.bf16.mxu1 %v2686_v15 }
 0x5d1   : > { %v1507_v51 = vpop.permute.xlu0 %1506  ;;  %v1380_v52 = vpop.permute.xlu1 %1379 }
 0x5d2   : > { %v1512_v53 = vsel %vm1125_vm4, %v1507_v51, 0 }
 0x5d5   : > { %v1505_v54 = vpop.permute.xlu1 %1504 }
 0x5d6   : > { %2088 = vmatmul.mubr.msk.bf16.vlgmr.msra.gmra.mrb[12].mxu1 %vm1125_vm4, %v1253_v48 }
 0x5d7   : > { %2098 = vmatpush3.bf16.xpose.msra.mxu1 %v1387_v50  ;;  %2099 = vmatprep.mubr.msk.bf16.mxu1 %vm2687_vm2, %v2686_v15 }
 0x5d8   : > { %2109 = vmatprep.subr.bf16.mxu1 %v2686_v15 }
 0x5de   : > { %2100 = vmatmul.mubr.msk.bf16.vlgmr.msra.gmra.mrb[16].mxu1 %vm1125_vm4, %v1380_v52 }
 0x5df   : > { %2110 = vmatpush3.bf16.xpose.msra.mxu1 %v1512_v53  ;;  %2111 = vmatprep.mubr.msk.bf16.mxu1 %vm2687_vm2, %v2686_v15 }
 0x5e0   : > { %2121 = vmatprep.subr.bf16.mxu1 %v2686_v15 }
 0x5e6   : > { %2112 = vmatmul.mubr.msk.bf16.vlgmr.msra.gmra.mrb[20].mxu1 %vm1125_vm4, %v1505_v54 }
 0x5e7   : > { %2125 = vmatprep.mubr.msk.bf16.mxu1 %vm2687_vm2, %v2686_v15 }
 0x636   : > { %v1166_v62 = vpop.f32.mrb[8].mxu1 }
 0x637   : > { %v1173_v63 = vmul.f32 0.35355338, %v1166_v62  ;;  %v2077_v0 = vpop.f32.mrb[9].mxu1 }
 0x638   : > { %v1169_v1 = vpop.f32.mrb[10].mxu1 }
 0x639   : > { %v1174_v2 = vmul.f32 0.35355338, %v1169_v1  ;;  %v2078_v3 = vpop.f32.mrb[11].mxu1  ;;  %v1181_v4 = vadd.f32 %v1179_v61, %v1173_v63 }
 0x63b   : > { %v1184_v5 = vsel %vm1183_vm5, %v1181_v4, -inf  ;;  %v1182_v6 = vadd.f32 %v1179_v61, %v1174_v2 }
 0x63c   : > { %1185 = vmax.xlane.f32.xlu0 %v1184_v5 }
 0x63d   : > { %v1187_v7 = vsel %vm1183_vm5, %v1182_v6, -inf }
 0x63e   : > { %1188 = vmax.xlane.f32.xlu1 %v1187_v7 }
 0x6a9   : > { %v1297_v8 = vpop.f32.mrb[12].mxu1 }
 0x6aa   : > { %v1304_v9 = vmul.f32 0.35355338, %v1297_v8  ;;  %v2089_v10 = vpop.f32.mrb[13].mxu1 }
 0x6ab   : > { %v1300_v11 = vpop.f32.mrb[14].mxu1 }
 0x6ac   : > { %v1305_v12 = vmul.f32 0.35355338, %v1300_v11  ;;  %v2090_v13 = vpop.f32.mrb[15].mxu1  ;;  %v1306_v14 = vadd.f32 %v1304_v9, %v1179_v61 }
 0x6ae   : > { %v1308_v18 = vsel %vm1183_vm5, %v1306_v14, -inf  ;;  %v1307_v19 = vadd.f32 %v1305_v12, %v1179_v61 }
 0x6af   : > { %1309 = vmax.xlane.f32.xlu0 %v1308_v18 }
 0x6b0   : > { %v1311_v23 = vsel %vm1183_vm5, %v1307_v19, -inf }
 0x6b1   : > { %v1423_v20 = vpop.f32.mrb[16].mxu1 }
 0x6b2   : > { %v1430_v21 = vmul.f32 0.35355338, %v1423_v20  ;;  %v2101_v22 = vpop.f32.mrb[17].mxu1 }
 0x6b3   : > { %1312 = vmax.xlane.f32.xlu0 %v1311_v23  ;;  %v1426_v24 = vpop.f32.mrb[18].mxu1 }
 0x6b4   : > { %v1431_v25 = vmul.f32 0.35355338, %v1426_v24  ;;  %v2102_v26 = vpop.f32.mrb[19].mxu1  ;;  %v1432_v27 = vadd.f32 %v1430_v21, %v1179_v61 }
 0x6b6   : > { %v1434_v28 = vsel %vm1183_vm5, %v1432_v27, -inf  ;;  %v1433_v29 = vadd.f32 %v1431_v25, %v1179_v61 }
 0x6b7   : > { %1435 = vmax.xlane.f32.xlu0 %v1434_v28 }
 0x6b8   : > { %v1437_v30 = vsel %vm1183_vm5, %v1433_v29, -inf }
 0x6b9   : > { %1438 = vmax.xlane.f32.xlu1 %v1437_v30  ;;  %v1548_v31 = vpop.f32.mrb[20].mxu1 }
 0x6ba   : > { %v1555_v32 = vmul.f32 0.35355338, %v1548_v31  ;;  %v2113_v33 = vpop.f32.mrb[21].mxu1 }
 0x6bb   : > { %v1551_v34 = vpop.f32.mrb[22].mxu1 }
 0x6bc   : > { %v1556_v35 = vmul.f32 0.35355338, %v1551_v34  ;;  %v2114_v37 = vpop.f32.mrb[23].mxu1  ;;  %v1557_v38 = vadd.f32 %v1555_v32, %v1179_v61 }
 0x6be   : > { %v1559_v39 = vsel %vm1183_vm5, %v1557_v38, -inf  ;;  %v3232_v40 = vadd.f32 %v1556_v35, %v1179_v61 }
 0x6bf   : > { %1560 = vmax.xlane.f32.xlu0 %v1559_v39 }
 0x6c0   : > { %v1562_v41 = vsel %vm1183_vm5, %v3232_v40, -inf }
 0x6c1   : > { %1563 = vmax.xlane.f32.xlu1 %v1562_v41 }
 0x6c9   : > { %v1186_v42 = vpop.xlane.xlu0 %1185 }
 0x6ca   : > { %v1190_v43 = vsub.f32 %v1181_v4, %v1186_v42 }
 0x6cb   : > { %v1189_v44 = vpop.xlane.xlu1 %1188 }
 0x6cc   : > { %v1192_v45 = vmul.f32 1.442695, %v1190_v43  ;;  %v1191_v46 = vsub.f32 %v1182_v6, %v1189_v44 }
 0x6ce   : > { %2301 = vpow2.f32 %v1192_v45  ;;  %v1194_v47 = vmul.f32 1.442695, %v1191_v46 }
 0x6d0   : > { %2303 = vpow2.f32 %v1194_v47 }
 0x6d8   : > { %v2302_v48 = vpop.eup %2301 }
 0x6d9   : > { %v1196_v49 = vsel %vm1183_vm5, %v2302_v48, 0.0 }
 0x6da   : > { %v2304_v50 = vpop.eup %2303  ;;  %1197 = vadd.xlane.f32.xlu0 %v1196_v49 }
 0x6db   : > { %v1199_v51 = vsel %vm1183_vm5, %v2304_v50, 0.0 }
 0x6dc   : > { %1200 = vadd.xlane.f32.xlu1 %v1199_v51 }
 0x73c   : > { %v1310_v52 = vpop.xlane.xlu0 %1309 }
 0x73d   : > { %v1314_v53 = vsub.f32 %v1306_v14, %v1310_v52 }
 0x73f   : > { %v1316_v54 = vmul.f32 1.442695, %v1314_v53 }
 0x740   : > { %v1313_v55 = vpop.xlane.xlu0 %1312 }
 0x741   : > { %2305 = vpow2.f32 %v1316_v54  ;;  %v1315_v56 = vsub.f32 %v1307_v19, %v1313_v55 }
 0x743   : > { %v1318_v57 = vmul.f32 1.442695, %v1315_v56 }
 0x744   : > { %v1436_v58 = vpop.xlane.xlu0 %1435 }
 0x745   : > { %2307 = vpow2.f32 %v1318_v57  ;;  %v1440_v59 = vsub.f32 %v1432_v27, %v1436_v58 }
 0x746   : > { %v1439_v60 = vpop.xlane.xlu1 %1438 }
 0x747   : > { %v1442_v61 = vmul.f32 1.442695, %v1440_v59  ;;  %v1441_v62 = vsub.f32 %v1433_v29, %v1439_v60  ;;  %v2291_v59 = vld [vmem:[#allocation16] sm:$0xff]  }
 0x748   : > { %2122 = vmatpush3.bf16.msra.mxu1 %v2291_v59 }
 0x749   : > { %2309 = vpow2.f32 %v1442_v61  ;;  %v1444_v63 = vmul.f32 1.442695, %v1441_v62  ;;  %2123 = vmatprep.subr.bf16.mxu1 %v2686_v15 }
 0x74b   : > { %v2306_v0 = vpop.eup %2305  ;;  %2311 = vpow2.f32 %v1444_v63 }
 0x74c   : > { %v1561_v1 = vpop.xlane.xlu0 %1560  ;;  %v1320_v2 = vsel %vm1183_vm5, %v2306_v0, 0.0 }
 0x74d   : > { %v1565_v3 = vsub.f32 %v1557_v38, %v1561_v1  ;;  %1321 = vadd.xlane.f32.xlu0 %v1320_v2 }
 0x74e   : > { %v1564_v13 = vpop.xlane.xlu1 %1563 }
 0x74f   : > { %v2308_v4 = vpop.eup %2307  ;;  %v1567_v5 = vmul.f32 1.442695, %v1565_v3  ;;  %v1566_v23 = vsub.f32 %v3232_v40, %v1564_v13  ;;  %v2292_v3 = vld [vmem:[#allocation16 + $0x8] sm:$0xff]  }
 0x750   : > { %v1323_v6 = vsel %vm1183_vm5, %v2308_v4, 0.0  ;;  %2124 = vmatpush3.bf16.msra.mxu1 %v2292_v3 }
 0x751   : > { %2313 = vpow2.f32 %v1567_v5  ;;  %1324 = vadd.xlane.f32.xlu1 %v1323_v6  ;;  %v1569_v25 = vmul.f32 1.442695, %v1566_v23 }
 0x753   : > { %v2310_v7 = vpop.eup %2309 }
 0x754   : > { %v1446_v8 = vsel %vm1183_vm5, %v2310_v7, 0.0 }
 0x755   : > { %v2312_v9 = vpop.eup %2311  ;;  %1447 = vadd.xlane.f32.xlu0 %v1446_v8 }
 0x756   : > { %v1449_v10 = vsel %vm1183_vm5, %v2312_v9, 0.0 }
 0x757   : > { %1450 = vadd.xlane.f32.xlu1 %v1449_v10 }
 0x75b   : > { %v2314_v11 = vpop.eup %2313 }
 0x75c   : > { %v1571_v12 = vsel %vm1183_vm5, %v2314_v11, 0.0 }
 0x75d   : > { %1572 = vadd.xlane.f32.xlu0 %v1571_v12 }
 0x767   : > { %v1198_v14 = vpop.xlane.xlu0 %1197 }
 0x768   : > { %2315 = vrcp.f32 %v1198_v14  ;;  %1457 = vrot.lane.b32.xlu1 %v3193_v36, %s2689_s24  ;;  %s3410_s24 = sld [smem:[#allocation34_spill]] }
 0x769   : > { %v1201_v18 = vpop.xlane.xlu1 %1200 }
 0x76a   : > { %2317 = vrcp.f32 %v1201_v18 }
 0x76b   : > { %2319 = vpow2.f32 %v1569_v25 }
 0x772   : > { %v2316_v19 = vpop.eup %2315 }
 0x773   : > { %1332 = vrot.lane.b32.xlu0 %v3193_v36, %s2688_s23  ;;  %v1204_v21 = vmul.f32 %v2316_v19, %v2302_v48 }
 0x774   : > { %v2318_v20 = vpop.eup %2317 }
 0x775   : > { %v1205_v22 = vmul.f32 %v2318_v20, %v2304_v50  ;;  %v2320_v26 = vpop.eup %2319 }
 0x776   : > { %v1574_v27 = vsel %vm1183_vm5, %v2320_v26, 0.0 }
 0x777   : > { %v1206_v24 = vpack.c.bf16 %v1205_v22, %v1204_v21 }
 0x779   : > { %2082 = vmatmul.mubr.msk.bf16.vlgmr.msra.gmra.mrb[8].mxu0 %vm1183_vm5, %v1206_v24 }
 0x77a   : > { %2093 = vmatprep.mubr.msk.bf16.mxu0 %vm2687_vm2, %v2686_v15 }
 0x78c   : > { %1575 = vadd.xlane.f32.xlu1 %v1574_v27  ;;  %v1994_v27 = vld [vmem:[%s3409_s16] ss:$0 sm:$0xff] }
 0x79d   : > { %1582 = vrot.lane.b32.xlu1 %v3193_v36, %s2690_s3  ;;  %s1962_s3 = sshll.u32 %s3090_s13, 4 }
 0x79e   : > { %s733_s16 = scalar_lea.vmem [#allocation17], %s1962_s3  ;;  %s2694_s3 = smov [#allocation17]  }
 0x7da   : > { %v1322_v28 = vpop.xlane.xlu0 %1321 }
 0x7de   : > { %v1325_v29 = vpop.xlane.xlu1 %1324 }
 0x7df   : > { %2321 = vrcp.f32 %v1325_v29 }
 0x7e0   : > { %2323 = vrcp.f32 %v1322_v28 }
 0x7e2   : > { %v1448_v31 = vpop.xlane.xlu0 %1447 }
 0x7e4   : > { %v1451_v30 = vpop.xlane.xlu1 %1450 }
 0x7e5   : > { %2325 = vrcp.f32 %v1451_v30 }
 0x7e6   : > { %2327 = vrcp.f32 %v1448_v31 }
 0x7e8   : > { %v1458_v36 = vpop.permute.xlu1 %1457 }
 0x7e9   : > { %v2322_v32 = vpop.eup %2321 }
 0x7ea   : > { %v1573_v33 = vpop.xlane.xlu0 %1572  ;;  %v2324_v34 = vpop.eup %2323  ;;  %v1329_v35 = vmul.f32 %v2322_v32, %v2308_v4 }
 0x7eb   : > { %v1328_v37 = vmul.f32 %v2324_v34, %v2306_v0  ;;  %2329 = vrcp.f32 %v1573_v33 }
 0x7ed   : > { %v1330_v39 = vpack.c.bf16 %v1329_v35, %v1328_v37 }
 0x7ee   : > { %v1333_v38 = vpop.permute.xlu0 %1332 }
 0x7ef   : > { %2092 = vmatpush3.bf16.msra.mxu0 %v1333_v38  ;;  %v2326_v40 = vpop.eup %2325 }
 0x7f0   : > { %2103 = vmatprep.subr.bf16.mxu0 %v2686_v15  ;;  %v2328_v41 = vpop.eup %2327  ;;  %v1455_v42 = vmul.f32 %v2326_v40, %v2312_v9 }
 0x7f1   : > { %v1454_v43 = vmul.f32 %v2328_v41, %v2310_v7 }
 0x7f2   : > { %2094 = vmatmul.mubr.msk.bf16.vlgmr.msra.gmra.mrb[12].mxu0 %vm1183_vm5, %v1330_v39 }
 0x7f3   : > { %2104 = vmatpush3.bf16.msra.mxu0 %v1458_v36  ;;  %2105 = vmatprep.mubr.msk.bf16.mxu0 %vm2687_vm2, %v2686_v15  ;;  %v1456_v44 = vpack.c.bf16 %v1455_v42, %v1454_v43 }
 0x7f4   : > { %2115 = vmatprep.subr.bf16.mxu0 %v2686_v15 }
 0x7f5   : > { %v2330_v47 = vpop.eup %2329 }
 0x7f6   : > { %v1579_v49 = vmul.f32 %v2330_v47, %v2314_v11 }
 0x7fa   : > { %2106 = vmatmul.mubr.msk.bf16.vlgmr.msra.gmra.mrb[16].mxu0 %vm1183_vm5, %v1456_v44 }
 0x7fb   : > { %2117 = vmatprep.mubr.msk.bf16.mxu0 %vm2687_vm2, %v2686_v15 }
 0x819   : > { %v1576_v45 = vpop.xlane.xlu1 %1575 }
 0x81a   : > { %2331 = vrcp.f32 %v1576_v45 }
 0x81d   : > { %v1583_v46 = vpop.permute.xlu1 %1582 }
 0x81e   : > { %2116 = vmatpush3.bf16.msra.mxu0 %v1583_v46 }
 0x824   : > { %v2332_v48 = vpop.eup %2331 }
 0x825   : > { %v1580_v50 = vmul.f32 %v2332_v48, %v2320_v26 }
 0x827   : > { %v1581_v51 = vpack.c.bf16 %v1580_v50, %v1579_v49 }
 0x829   : > { %2118 = vmatmul.mubr.msk.bf16.vlgmr.msra.gmra.mrb[20].mxu0 %vm1183_vm5, %v1581_v51 }
 0x84c   : > { %v1244_v52 = vpop.f32.mrb[8].mxu0 }
 0x84d   : > { %v2083_v53 = vpop.f32.mrb[9].mxu0 }
 0x84e   : > { %v1247_v54 = vpop.f32.mrb[10].mxu0  ;;  %v1998_v53 = vld [vmem:[%s3410_s24] ss:$0 sm:$0xff]  ;;  %s3412_s24 = sld [smem:[#allocation36_spill]] }
 0x84f   : > { %v2084_v55 = vpop.f32.mrb[11].mxu0 }
 0x850   : > { %v1999_v55 = vld [vmem:[%s3411_s14] ss:$0 sm:$0xff] }
 0x854   : > { %s3291_s1 = scalar_lea.hbm %s3412_s24, %s2006_s29 }
 0x8c5   : > { %v1372_v56 = vpop.f32.mrb[12].mxu0 }
 0x8c6   : > { %v2095_v57 = vpop.f32.mrb[13].mxu0 }
 0x8c7   : > { %v1375_v58 = vpop.f32.mrb[14].mxu0 }
 0x8c8   : > { %v2267_v60 = vpack.i.bf16 %v1375_v58, %v1372_v56  ;;  %v2096_v61 = vpop.f32.mrb[15].mxu0 }
 0x8ca   : > { %2268 = vrot.lane.b32.xlu1 %v2267_v60, %s3367_s9  ;;  %s1783_s9 = sshll.u32 %s733_s16, 4  ;;  %s3293_s9 = int_to_ptr.vmem [resolvable:$true] %s1783_s9 }
 0x8cb   : > { %s2591_s2 = scalar_lea.vmem %s3293_s9, 256 }
 0x8cc   : > { %p2592_p13 = scmp.ne.s32.totalorder %s3293_s9, %s2591_s2 }
 0x8cd   : > { %v1497_v62 = vpop.f32.mrb[16].mxu0 }
 0x8ce   : > { %v2107_v63 = vpop.f32.mrb[17].mxu0  ;;  %p2593_p3 = pnand %p2592_p13, %p3413_p1 }
 0x8cf   : > { %v1500_v0 = vpop.f32.mrb[18].mxu0 }
 0x8d0   : > { %v2272_v1 = vpack.i.bf16 %v1500_v0, %v1497_v62  ;;  %v2108_v2 = vpop.f32.mrb[19].mxu0  ;;  %p2594_p2 = pneg %p2593_p3 }
 0x8d2   : > { %2273 = vrot.lane.b32.xlu0 %v2272_v1, %s2692_s5  ;;  %s1770_s5 = scalar_lea.sflag [#allocation4], %s3090_s13 }
 0x8fc   : > { %v1622_v4 = vpop.f32.mrb[20].mxu0 }
 0x8fd   : > { %v2119_v5 = vpop.f32.mrb[21].mxu0 }
 0x8fe   : > { %v1625_v6 = vpop.f32.mrb[22].mxu0 }
 0x8ff   : > { %v2277_v7 = vpack.i.bf16 %v1625_v6, %v1622_v4  ;;  %v2120_v8 = vpop.f32.mrb[23].mxu0 }
 0x901   : > { %2278 = vrot.lane.b32.xlu1 %v2277_v7, %s2693_s19  ;;  %s2595_s19 = sshll.u32 %s2694_s3, 4  ;;  %s2596_s19 = int_to_ptr.vmem [resolvable:$false] %s2595_s19 }
 0x902   : > { %s2597_s14 = scalar_lea.vmem %s2596_s19, 512  ;;  %p2598_p0 = scmp.lt.s32.totalorder %s3293_s9, %s2596_s19 }
 0x903   : > { %p2599_p10 = scmp.lt.s32.totalorder %s2597_s14, %s2591_s2 }
 0x905   : > { %p2600_p11 = por %p2599_p10, %p2598_p0 }
 0x907   : > { %p2601_p12 = pnand %p2600_p11, %p2594_p2 }
 0x93c   : > { %v2269_v9 = vpop.permute.xlu1 %2268 }
 0x93d   : > { %v2271_v11 = vunpack.i.h.bf16 %v2269_v9  ;;  %v2270_v15 = vunpack.i.l.bf16 %v2269_v9 }
 0x93f   : > { %v1654_v18 = vsel %vm1125_vm4, %v1247_v54, %v2271_v11  ;;  %v1653_v19 = vsel %vm1125_vm4, %v1244_v52, %v2270_v15 }
 0x944   : > { %v2274_v10 = vpop.permute.xlu0 %2273 }
 0x945   : > { %v2276_v12 = vunpack.i.h.bf16 %v2274_v10  ;;  %v2275_v13 = vunpack.i.l.bf16 %v2274_v10 }
 0x947   : > { %v1656_v22 = vsel %vm1183_vm5, %v1654_v18, %v2276_v12  ;;  %v1655_v23 = vsel %vm1183_vm5, %v1653_v19, %v2275_v13 }
 0x973   : > { %v2279_v14 = vpop.permute.xlu1 %2278 }
 0x974   : > { %v2281_v20 = vunpack.i.h.bf16 %v2279_v14  ;;  %v2280_v21 = vunpack.i.l.bf16 %v2279_v14 }
 0x976   : > { %v1659_v24 = vsel %vm1657_vm6, %v1656_v22, %v2281_v20  ;;  %v1658_v25 = vsel %vm1657_vm6, %v1655_v23, %v2280_v21 }
 0x977   : > { %v1660_v26 = vpack.c.bf16 %v1659_v24, %v1658_v25 }
 0x979   : > { %2126 = vmatmul.mubr.msk.bf16.vlgmr.msra.gmra.mrb[24].mxu1 %vm872_vm3, %v1660_v26 }
 0xa4c   : > { %v1716_v28 = vpop.f32.mrb[24].mxu1 }
 0xa4d   : > { %v1717_v29 = vadd.f32 %v1994_v27, %v1716_v28  ;;  %v2127_v30 = vpop.f32.mrb[25].mxu1 }
 0xa4e   : > { %v1719_v31 = vpop.f32.mrb[26].mxu1 }
 0xa4f   : > { %v1720_v32 = vadd.f32 %v1994_v27, %v1719_v31  ;;  %v2128_v33 = vpop.f32.mrb[27].mxu1  ;;  %v1723_v34 = vadd.f32 %v1717_v29, %v3173_v16 }
 0xa51   : > { %v1725_v35 = vsel %vm872_vm3, %v1723_v34, 0.0  ;;  %v1724_v37 = vadd.f32 %v1720_v32, %v3175_v17 }
 0xa52   : > { %1726 = vadd.xlane.f32.xlu0 %v1725_v35 }
 0xa53   : > { %v1728_v38 = vsel %vm872_vm3, %v1724_v37, 0.0 }
 0xa54   : > { %1729 = vadd.xlane.f32.xlu1 %v1728_v38 }
 0xadf   : > { %v1727_v39 = vpop.xlane.xlu0 %1726 }
 0xae0   : > { %v1731_v40 = vmul.f32 0.03125, %v1727_v39 }
 0xae1   : > { %v1730_v36 = vpop.xlane.xlu1 %1729 }
 0xae2   : > { %v1733_v41 = vsub.f32 %v1723_v34, %v1731_v40  ;;  %v1732_v42 = vmul.f32 0.03125, %v1730_v36 }
 0xae4   : > { %v1734_v43 = vsub.f32 %v1724_v37, %v1732_v42  ;;  %v1735_v44 = vmul.f32 %v1733_v41, %v1733_v41 }
 0xae6   : > { %v1737_v45 = vsel %vm872_vm3, %v1735_v44, 0.0  ;;  %v1736_v46 = vmul.f32 %v1734_v43, %v1734_v43 }
 0xae7   : > { %1738 = vadd.xlane.f32.xlu0 %v1737_v45 }
 0xae8   : > { %v1740_v16 = vsel %vm872_vm3, %v1736_v46, 0.0 }
 0xaeb   : > { %1741 = vadd.xlane.f32.xlu0 %v1740_v16 }
 0xb74   : > { %v1739_v17 = vpop.xlane.xlu0 %1738 }
 0xb75   : > { %v1743_v47 = vmul.f32 0.03125, %v1739_v17 }
 0xb77   : > { %v1745_v48 = vadd.f32 1e-12, %v1743_v47 }
 0xb78   : > { %v1742_v49 = vpop.xlane.xlu0 %1741 }
 0xb79   : > { %2333 = vrsqrt.f32 %v1745_v48  ;;  %v1744_v50 = vmul.f32 0.03125, %v1742_v49 }
 0xb7b   : > { %v1746_v51 = vadd.f32 1e-12, %v1744_v50 }
 0xb7d   : > { %2335 = vrsqrt.f32 %v1746_v51 }
 0xb83   : > { %v2334_v52 = vpop.eup %2333 }
 0xb84   : > { %v1749_v54 = vmul.f32 %v2334_v52, %v1733_v41 }
 0xb86   : > { %v1757_v56 = vmul.f32 %v1998_v53, %v1749_v54 }
 0xb87   : > { %v2336_v57 = vpop.eup %2335 }
 0xb88   : > { %v1765_v58 = vadd.f32 %v1999_v55, %v1757_v56  ;;  %v1750_v59 = vmul.f32 %v2336_v57, %v1734_v43 }
 0xb8a   : > { %v1758_v60 = vmul.f32 %v1998_v53, %v1750_v59  ;;  %1767 = vst.msk [vmem:[%s733_s16] sm:$0xff] %vm872_vm3, %v1765_v58 }
 0xb8c   : > { %v1766_v61 = vadd.f32 %v1999_v55, %v1758_v60 }
 0xb8e   : > { %1768 = vst.msk [vmem:[%s733_s16 + $0x8] sm:$0xff] %vm872_vm3, %v1766_v61 }
 0xb8f   : > { %2604 = shalt.err (!%p2601_p12)
}
 0xb90   : > { %s2605_s29 = scalar_lea.hbm %s3291_s1, 256  ;;  %s2609_s23 = scalar_lea.hbm %s3412_s24, 512 }
 0xb91   : > { %p2606_p8 = scmp.ne.s32.totalorder %s3291_s1, %s2605_s29  ;;  %p2610_p6 = scmp.lt.u32.totalorder %s3291_s1, %s3412_s24 }
 0xb92   : > { %p2611_p9 = scmp.lt.u32.totalorder %s2609_s23, %s2605_s29  ;;  %p2613_p13 = scmp.lt.u32.totalorder %s2605_s29, %s3291_s1 }
 0xb93   : > { %p2607_p5 = pnand %p2606_p8, %p3413_p1 }
 0xb94   : > { %p2612_p4 = por %p2611_p9, %p2610_p6 }
 0xb95   : > { %p2608_p7 = pneg %p2607_p5 }
 0xb96   : > { %p2614_p3 = por %p2613_p13, %p2612_p4 }
 0xb98   : > { %p2615_p2 = pnand %p2614_p3, %p2608_p7 }
 0xb9a   : > { %2618 = shalt.err (!%p2615_p2)
}
 0xb9b   : > { %s2695_s2 = smov 128   ;;  %s3414_s14 = smov 8  }
 0xb9c   : > { %2163 = dma.vmem_to_hbm [thread:$0]  (%p3413_p1), %s3293_s9, 256, %s3291_s1, %s1770_s5, %s2695_s2, %s2695_s2, %s3414_s14  }
 0xb9d PF: > { %s1798_s16 = sand.u32 1, %s2661_s0   ;;  %p3415_p0 = scmp.ne.s32.totalorder %s3392_s26, 0 }
 0xb9e   : > { %p3416_p10 = scmp.ge.s32.totalorder %s2673_s21, 2  ;;  %s1799_s29 = scalar_lea.sflag [#allocation4], %s1798_s16 }
 0xba0   : > { %p2195_p11 = pnand %p3416_p10, %p3415_p0 }
 0xba2   : > { %2656 = dma.done.wait (!%p2195_p11), %s1799_s29, 256  }
 0xba3   : > { %2658 = vsyncadd (!%p2195_p11), %s1799_s29, 4294967040  ;;  %p36_p12 = scmp.ge.s32.totalorder %s3014_s27, 4   ;;  %s3417_s0 = smov %s2665_s30 }
 0xba4   : > { %s3418_s30 = smov %s2669_s20  ;;  %s3419_s20 = smov %s3025_s25 }
 0xba5   : > { %s3420_s21 = smov %s3014_s27  ;;  %38 = sbr.rel (!%p36_p12) target bundleno = 23 (0x17), region = 176 }
 0xbac   :  { %1804 = vsyncpa [#allocation3], 1 }
 0xbad   :  { %1806 = vsyncpa [#allocation3 + $0x1], 1 }
 0xbae   :  { %1807 = vsyncpa [#allocation6], 1 }
 0xbaf   :  { %1808 = vsyncpa [#allocation9], 1 }
 0xbb0   :  { %1809 = vsyncpa [#allocation12], 1 }
 0xbb1   :  { %1810 = vsyncpa [#allocation15], 1 }
 0xbb2   :  { %1811 = vsyncpa [#allocation4], 1 }
 0xbb3   :  { %1813 = vsyncpa [#allocation4 + $0x1], 1 }

</bundles_post_ra>
